<compile_context>
chip_gen: v6e
topology: v6e:2x2x1
jax: 0.10.0
libtpu: 0.0.40
codegen_flags: <defaults>
</compile_context>

<pallas_src>
import functools

import jax
import jax.numpy as jnp
from jax import lax
from jax.experimental import pallas as pl
from jax.experimental.pallas import tpu as pltpu

N_GROUPS = 8
GN_EPS = 1e-5
K = 5            # Conv1d kernel size
PAD = K // 2
KT = 4           # ConvTranspose1d kernel size


# ----------------------------------------------------------------------------
# Fused kernel: (conv5+GN+Mish) x2 + 1x1 residual, (conv5+GN+Mish) x2 + identity,
#               ConvTranspose1d(k=4, s=2, p=1) emitted as de-interleaved even/odd phases.
# Grid: one step per batch tile ("parallel"); lanes = (batch-in-tile, horizon).
# ----------------------------------------------------------------------------
def _upsampler_kernel(x_ref, wconv_ref, aff_ref, wr_ref, br_ref, wt2_ref, bt2_ref,
                      gmask2_ref, segm_ref, o_ref, *, hh):
    c1 = wr_ref.shape[0]                      # output channels (dim_in)
    cmax = wconv_ref.shape[2] // K            # padded input-channel count
    n = x_ref.shape[2]                        # Btile * hh packed lanes
    g = c1 // N_GROUPS
    inv_n = 1.0 / float(g * hh)

    # Lane position within each batch segment (tiny per-step constant, amortized over Btile).
    jmod = lax.broadcasted_iota(jnp.int32, (1, n), 1) % hh

    segm = segm_ref[...]                      # (n, n)   same-batch-segment 0/1 mask
    gmask2 = gmask2_ref[...]                  # (2c1,2c1) block-diag same-GN-group 0/1 mask

    def seg_shift(v, d):
        # w[:, b*hh + j] = v[:, b*hh + j + d] if 0 <= j+d < hh else 0.
        # Circular lane shift via slice+concat (XLU), then zero the segment boundaries.
        if d == 0:
            return v
        rot = jnp.concatenate([v[:, d:], v[:, :d]], axis=-1)   # rot[:, l] = v[:, (l+d) % n]
        mask = (jmod < (hh - d)) if d > 0 else (jmod >= (-d))
        return jnp.where(mask, rot, 0.0)

    def conv_gn_mish(v, idx):
        # Zero-pad channels to the common padded count (static no-op when c0 <= c1).
        if v.shape[0] < cmax:
            v = jnp.concatenate(
                [v, jnp.zeros((cmax - v.shape[0], n), v.dtype)], axis=0)
        # --- Conv1d(k=5, SAME): im2col built in-register, single MXU matmul ---
        col = jnp.concatenate([seg_shift(v, k - PAD) for k in range(K)], axis=0)  # (K*cmax, n)
        aff = aff_ref[idx]                                   # (3, c1, 1): bias, gamma, beta
        y = jnp.dot(wconv_ref[idx], col, preferred_element_type=jnp.float32) + aff[0]
        # --- GroupNorm(8), one-pass stats: segment-sum matmul + group-sum matmul ---
        y2 = jnp.concatenate([y, y * y], axis=0)             # (2*c1, n)
        seg_sums = jnp.dot(y2, segm, preferred_element_type=jnp.float32)
        grp = jnp.dot(gmask2, seg_sums, preferred_element_type=jnp.float32) * inv_n
        mean = grp[:c1]
        var = jnp.maximum(grp[c1:] - mean * mean, 0.0)
        yn = (y - mean) * lax.rsqrt(var + GN_EPS) * aff[1] + aff[2]
        # --- Mish with a single exp: y*tanh(softplus(y)) = y*u/(u+2), u=t(t+2), t=exp(min(y,20))
        t = jnp.exp(jnp.minimum(yn, 20.0))
        u = t * (t + 2.0)
        return yn * (u / (u + 2.0))

    x0 = x_ref[0]                                            # (cmax, n) packed input

    # ResidualConvolutionBlock 0: c0 -> c1, 1x1-conv residual fused into the epilogue.
    h = conv_gn_mish(x0, 0)
    h = conv_gn_mish(h, 1)
    h = h + jnp.dot(wr_ref[...], x0, preferred_element_type=jnp.float32) + br_ref[...]

    # ResidualConvolutionBlock 1: c1 -> c1, identity residual -> plain VPU add.
    x1 = h
    h = conv_gn_mish(x1, 2)
    h = conv_gn_mish(h, 3)
    h = h + x1

    # ConvTranspose1d(c1, c1, k=4, stride=2, padding=1), ONE fused matmul:
    #   even[:, j] = W1^T h[:, j]   + W3^T h[:, j-1] + b
    #   odd [:, j] = W0^T h[:, j+1] + W2^T h[:, j]   + b
    # LHS (packed at init): [[W3^T, W1^T, 0], [0, W2^T, W0^T]];  RHS: [h_prev; h; h_next].
    rhs = jnp.concatenate([seg_shift(h, -1), h, seg_shift(h, 1)], axis=0)   # (3*c1, n)
    o_ref[0] = (jnp.dot(wt2_ref[...], rhs, preferred_element_type=jnp.float32)
                + bt2_ref[...])                              # (2*c1, n): [even; odd]


def _build_masks(c1, hh, btile):
    g = c1 // N_GROUPS
    ci = jnp.arange(c1)
    gm = (ci[:, None] // g == ci[None, :] // g).astype(jnp.float32)       # (c1, c1)
    z = jnp.zeros((c1, c1), jnp.float32)
    gmask2 = jnp.concatenate([jnp.concatenate([gm, z], axis=1),
                              jnp.concatenate([z, gm], axis=1)], axis=0)  # (2c1, 2c1)
    n = btile * hh
    li = jnp.arange(n)
    segm = (li[:, None] // hh == li[None, :] // hh).astype(jnp.float32)   # (n, n)
    return gmask2, segm


def upsampler_fused(x, packed):
    """x: (B, dim_out, H) f32; packed: pre-packed weights. Returns (B, dim_in, 2H) f32."""
    wconv, aff, wr, br, wt2, bt2 = packed
    bsz, c0, hh = x.shape
    c1 = wr.shape[0]
    cmax = wconv.shape[2] // K

    # --- batch-tile selection: pack batch along lanes (target 128 lanes per step) while
    #     keeping >= 2 grid steps when the batch allows it (v7x dual TensorCore).
    max_bt = max(1, 128 // hh)
    btile = 1
    for d in range(1, min(bsz, max_bt) + 1):
        if bsz % d == 0:
            btile = d
    if bsz // btile < 2:
        for d in range(btile - 1, 0, -1):
            if bsz % d == 0 and bsz // d >= 2:
                btile = d
                break
    grid = bsz // btile
    n = btile * hh

    # --- one-time activation plumbing (XLA side): zero-pad channels to cmax and lane-pack
    #     the batch: (B, c0, H) -> (G, cmax, Btile*H), lanes batch-major.
    xp = x
    if c0 < cmax:
        xp = jnp.concatenate([xp, jnp.zeros((bsz, cmax - c0, hh), xp.dtype)], axis=1)
    xp = xp.reshape(grid, btile, cmax, hh).transpose(0, 2, 1, 3).reshape(grid, cmax, n)

    gmask2, segm = _build_masks(c1, hh, btile)

    raw = pl.pallas_call(
        functools.partial(_upsampler_kernel, hh=hh),
        out_shape=jax.ShapeDtypeStruct((grid, 2 * c1, n), jnp.float32),
        grid_spec=pltpu.PrefetchScalarGridSpec(
            num_scalar_prefetch=0,
            grid=(grid,),
            in_specs=[
                pl.BlockSpec((1, cmax, n), lambda i: (i, 0, 0)),           # packed input
                pl.BlockSpec((4, c1, K * cmax), lambda i: (0, 0, 0)),      # 4 conv weights
                pl.BlockSpec((4, 3, c1, 1), lambda i: (0, 0, 0, 0)),       # bias/gamma/beta x4
                pl.BlockSpec((c1, cmax), lambda i: (0, 0)),                # residual 1x1 conv
                pl.BlockSpec((c1, 1), lambda i: (0, 0)),                   # residual bias
                pl.BlockSpec((2 * c1, 3 * c1), lambda i: (0, 0)),          # fused transpose-conv
                pl.BlockSpec((2 * c1, 1), lambda i: (0, 0)),               # transpose-conv bias x2
                pl.BlockSpec((2 * c1, 2 * c1), lambda i: (0, 0)),          # GN group mask (const)
                pl.BlockSpec((n, n), lambda i: (0, 0)),                    # batch-segment mask
            ],
            out_specs=pl.BlockSpec((1, 2 * c1, n), lambda i: (i, 0, 0)),
        ),
        compiler_params=pltpu.CompilerParams(dimension_semantics=("parallel",)),
    )(xp, wconv, aff, wr, br, wt2, bt2, gmask2, segm)

    # De-interleaved phases -> (B, c1, 2H): raw[g, p*c1 + c, bt*hh + j] = phase p, pos j.
    out = raw.reshape(grid, 2, c1, btile, hh).transpose(0, 3, 2, 4, 1)
    return out.reshape(bsz, c1, 2 * hh)


# ----------------------------------------------------------------------------
# Deterministic parameter init (PyTorch layouts) + one-time packing for the kernel
# ----------------------------------------------------------------------------
def init_conv1d_block(key, cin, cout, k=K):
    k1, k2, k3, k4 = jax.random.split(key, 4)
    return dict(
        w=0.2 * jax.random.normal(k1, (cout, cin, k), jnp.float32),
        b=0.1 * jax.random.normal(k2, (cout,), jnp.float32),
        gamma=1.0 + 0.1 * jax.random.normal(k3, (cout,), jnp.float32),
        beta=0.1 * jax.random.normal(k4, (cout,), jnp.float32),
    )


def init_rcb(key, cin, cout, k=K):
    k0, k1, k2, k3 = jax.random.split(key, 4)
    if cin != cout:
        wr = 0.2 * jax.random.normal(k2, (cout, cin), jnp.float32)
        br = 0.1 * jax.random.normal(k3, (cout,), jnp.float32)
    else:
        wr, br = None, None                   # nn.Identity() residual
    return dict(b0=init_conv1d_block(k0, cin, cout, k),
                b1=init_conv1d_block(k1, cout, cout, k),
                wr=wr, br=br)


def init_upsampler(key, dim_in, dim_out):
    k0, k1, k2, k3 = jax.random.split(key, 4)
    return dict(
        rcb0=init_rcb(k0, dim_out, dim_in),
        rcb1=init_rcb(k1, dim_in, dim_in),
        wt=0.2 * jax.random.normal(k2, (dim_in, dim_in, KT), jnp.float32),   # (Cin, Cout, 4)
        bt=0.1 * jax.random.normal(k3, (dim_in,), jnp.float32),
    )


def pack_upsampler(params):
    """One-time weight repack + constant consolidation (parameters only; no per-call glue)."""
    w0 = params["rcb0"]["b0"]["w"]
    c1, c0 = w0.shape[0], w0.shape[1]
    cmax = max(c0, c1)

    def pack_conv(p):
        w = p["w"]                                           # (cout, cin, K)
        cout, cin, k = w.shape
        if cin < cmax:                                       # pad cin so all 4 stack together
            w = jnp.concatenate([w, jnp.zeros((cout, cmax - cin, k), w.dtype)], axis=1)
        w2 = jnp.transpose(w, (0, 2, 1)).reshape(cout, k * cmax)   # column k*cmax + c
        aff = jnp.stack([p["b"], p["gamma"], p["beta"]], axis=0).reshape(3, cout, 1)
        return w2, aff

    blocks = [pack_conv(params[r][b]) for r in ("rcb0", "rcb1") for b in ("b0", "b1")]
    wconv = jnp.stack([b[0] for b in blocks], axis=0)        # (4, c1, K*cmax)
    aff = jnp.stack([b[1] for b in blocks], axis=0)          # (4, 3, c1, 1)

    wr, br = params["rcb0"]["wr"], params["rcb0"]["br"]
    if wr is None:                                           # dim_in == dim_out: exact identity
        wr = jnp.eye(c1, dtype=jnp.float32)
        br = jnp.zeros((c1,), jnp.float32)
    if wr.shape[1] < cmax:
        wr = jnp.concatenate([wr, jnp.zeros((c1, cmax - wr.shape[1]), jnp.float32)], axis=1)
    br = br.reshape(c1, 1)

    # ConvTranspose1d weight (Cin, Cout, 4) -> fused LHS [[W3^T, W1^T, 0], [0, W2^T, W0^T]].
    wt, bt = params["wt"], params["bt"]
    wk = [wt[:, :, k].T for k in range(KT)]                  # (Cout, Cin) per tap
    z = jnp.zeros((c1, c1), jnp.float32)
    wt2 = jnp.concatenate([jnp.concatenate([wk[3], wk[1], z], axis=1),
                           jnp.concatenate([z, wk[2], wk[0]], axis=1)], axis=0)  # (2c1, 3c1)
    bt2 = jnp.concatenate([bt, bt], axis=0).reshape(2 * c1, 1)
    return wconv, aff, wr, br, wt2, bt2


# ----------------------------------------------------------------------------
# Pure-JAX reference (numerical verification only)
# ----------------------------------------------------------------------------
def _ref_conv1d(x, w, b):
    pad = w.shape[-1] // 2
    y = lax.conv_general_dilated(x, w, window_strides=(1,), padding=[(pad, pad)],
                                 dimension_numbers=("NCH", "OIH", "NCH"),
                                 precision=lax.Precision.HIGHEST)
    return y + b[None, :, None]


def _ref_groupnorm(x, gamma, beta):
    bsz, c, hh = x.shape
    xr = x.reshape(bsz, N_GROUPS, -1)
    m = xr.mean(-1, keepdims=True)
    v = xr.var(-1, keepdims=True)
    xn = ((xr - m) / jnp.sqrt(v + GN_EPS)).reshape(bsz, c, hh)
    return xn * gamma[None, :, None] + beta[None, :, None]


def _ref_mish(y):
    sp = jnp.maximum(y, 0.0) + jnp.log(1.0 + jnp.exp(-jnp.abs(y)))
    return y * jnp.tanh(sp)


def _ref_rcb(x, p):
    h = _ref_mish(_ref_groupnorm(_ref_conv1d(x, p["b0"]["w"], p["b0"]["b"]),
                                 p["b0"]["gamma"], p["b0"]["beta"]))
    h = _ref_mish(_ref_groupnorm(_ref_conv1d(h, p["b1"]["w"], p["b1"]["b"]),
                                 p["b1"]["gamma"], p["b1"]["beta"]))
    if p["wr"] is None:
        res = x
    else:
        res = (jnp.einsum("oc,bch->boh", p["wr"], x, precision=lax.Precision.HIGHEST)
               + p["br"][None, :, None])
    return h + res


def _ref_conv_transpose(x, w, b):
    wref = jnp.transpose(w, (1, 0, 2))[:, :, ::-1]
    y = lax.conv_general_dilated(x, wref, window_strides=(1,), padding=[(2, 2)],
                                 lhs_dilation=(2,),
                                 dimension_numbers=("NCH", "OIH", "NCH"),
                                 precision=lax.Precision.HIGHEST)
    return y + b[None, :, None]


def _ref_upsampler(x, params):
    x = _ref_rcb(x, params["rcb0"])
    x = _ref_rcb(x, params["rcb1"])
    return _ref_conv_transpose(x, params["wt"], params["bt"])


# ----------------------------------------------------------------------------
if __name__ == "__main__":
    dim_in, dim_out = 16, 8              # UpSampler(dim_in=16, dim_out=8)
    batch, horizon = 16, 16              # Btile=8 -> 128 packed lanes, grid=2 (both v7x TCs)
    key = jax.random.PRNGKey(0)
    kx, kp = jax.random.split(key)
    x = jax.random.normal(kx, (batch, dim_out, horizon), jnp.float32)   # (B, dim_out, H)
    params = init_upsampler(kp, dim_in, dim_out)
    packed = pack_upsampler(params)

    fn = jax.jit(upsampler_fused)
    out = jax.block_until_ready(fn(x, packed))
    assert out.shape == (batch, dim_in, 2 * horizon), out.shape

    ref = jax.block_until_ready(_ref_upsampler(x, params))
    assert jnp.allclose(out, ref, rtol=2e-3, atol=2e-3), float(jnp.max(jnp.abs(out - ref)))

    print("KERNEL_OK")
</pallas_src>

<mosaic_0001>
module attributes {stable_mosaic.version = 11 : i64} {
  func.func @_upsampler_kernel(%arg0: i32, %arg1: memref<1x16x128xf32, #tpu.memory_space<vmem>>, %arg2: memref<4x16x80xf32, #tpu.memory_space<vmem>>, %arg3: memref<4x3x16x1xf32, #tpu.memory_space<vmem>>, %arg4: memref<16x16xf32, #tpu.memory_space<vmem>>, %arg5: memref<16x1xf32, #tpu.memory_space<vmem>>, %arg6: memref<32x48xf32, #tpu.memory_space<vmem>>, %arg7: memref<32x1xf32, #tpu.memory_space<vmem>>, %arg8: memref<32x32xf32, #tpu.memory_space<vmem>>, %arg9: memref<128x128xf32, #tpu.memory_space<vmem>>, %arg10: memref<1x32x128xf32, #tpu.memory_space<vmem>>) attributes {dimension_semantics = [#tpu.dimension_semantics<parallel>], iteration_bounds = array<i64: 2>, scalar_prefetch = 0 : i64, scratch_operands = 0 : i64, tpu.core_type = #tpu.core_type<tc>, window_params = [{transform_indices = @transform_0, window_bounds = array<i64: 1, 16, 128>}, {pipeline_mode = #tpu.pipeline_mode<synchronous>, transform_indices = @transform_1, window_bounds = array<i64: 4, 16, 80>}, {pipeline_mode = #tpu.pipeline_mode<synchronous>, transform_indices = @transform_2, window_bounds = array<i64: 4, 3, 16, 1>}, {pipeline_mode = #tpu.pipeline_mode<synchronous>, transform_indices = @transform_3, window_bounds = array<i64: 16, 16>}, {pipeline_mode = #tpu.pipeline_mode<synchronous>, transform_indices = @transform_4, window_bounds = array<i64: 16, 1>}, {pipeline_mode = #tpu.pipeline_mode<synchronous>, transform_indices = @transform_5, window_bounds = array<i64: 32, 48>}, {pipeline_mode = #tpu.pipeline_mode<synchronous>, transform_indices = @transform_6, window_bounds = array<i64: 32, 1>}, {pipeline_mode = #tpu.pipeline_mode<synchronous>, transform_indices = @transform_7, window_bounds = array<i64: 32, 32>}, {pipeline_mode = #tpu.pipeline_mode<synchronous>, transform_indices = @transform_8, window_bounds = array<i64: 128, 128>}, {transform_indices = @transform_9, window_bounds = array<i64: 1, 32, 128>}]} {
    %0 = tpu.iota {dimensions = array<i32: 1>} : vector<1x128xi32>
    %c16_i32 = arith.constant 16 : i32
    %c0_i32 = arith.constant 0 : i32
    %1 = arith.cmpi eq, %c16_i32, %c0_i32 : i32
    %c1_i32 = arith.constant 1 : i32
    %2 = arith.select %1, %c1_i32, %c16_i32 : i32
    %3 = vector.broadcast %2 : i32 to vector<1x128xi32>
    %4 = arith.remsi %0, %3 : vector<1x128xi32>
    %c0_i32_0 = arith.constant 0 : i32
    %5 = vector.broadcast %c0_i32_0 : i32 to vector<1x128xi32>
    %6 = arith.cmpi ne, %4, %5 : vector<1x128xi32>
    %c0_i32_1 = arith.constant 0 : i32
    %7 = vector.broadcast %c0_i32_1 : i32 to vector<1x128xi32>
    %8 = arith.cmpi slt, %4, %7 : vector<1x128xi32>
    %c0_i32_2 = arith.constant 0 : i32
    %9 = arith.cmpi slt, %2, %c0_i32_2 : i32
    %10 = vector.broadcast %9 : i1 to vector<1x128xi1>
    %11 = vector.broadcast %10 : vector<1x128xi1> to vector<1x128xi1>
    %12 = arith.xori %8, %11 : vector<1x128xi1>
    %13 = arith.andi %12, %6 : vector<1x128xi1>
    %14 = vector.broadcast %2 : i32 to vector<1x128xi32>
    %15 = arith.addi %4, %14 : vector<1x128xi32>
    %16 = arith.select %13, %15, %4 : vector<1x128xi1>, vector<1x128xi32>
    %c0 = arith.constant 0 : index
    %c0_3 = arith.constant 0 : index
    %17 = vector.load %arg9[%c0, %c0_3] : memref<128x128xf32, #tpu.memory_space<vmem>>, vector<128x128xf32>
    %c0_4 = arith.constant 0 : index
    %c0_5 = arith.constant 0 : index
    %18 = vector.load %arg8[%c0_4, %c0_5] : memref<32x32xf32, #tpu.memory_space<vmem>>, vector<32x32xf32>
    %c0_6 = arith.constant 0 : index
    %c0_7 = arith.constant 0 : index
    %c0_8 = arith.constant 0 : index
    %19 = vector.load %arg1[%c0_6, %c0_7, %c0_8] : memref<1x16x128xf32, #tpu.memory_space<vmem>>, vector<1x16x128xf32>
    %20 = vector.shape_cast %19 : vector<1x16x128xf32> to vector<16x128xf32>
    %21 = vector.extract_strided_slice %20 {offsets = [0, 126], sizes = [16, 2], strides = [1, 1]} : vector<16x128xf32> to vector<16x2xf32>
    %22 = vector.extract_strided_slice %20 {offsets = [0, 0], sizes = [16, 126], strides = [1, 1]} : vector<16x128xf32> to vector<16x126xf32>
    %23 = tpu.concatenate %21, %22 in 1 : vector<16x2xf32>, vector<16x126xf32> -> vector<16x128xf32>
    %c2_i32 = arith.constant 2 : i32
    %24 = vector.broadcast %c2_i32 : i32 to vector<1x128xi32>
    %25 = arith.cmpi sge, %16, %24 : vector<1x128xi32>
    %cst = arith.constant 0.000000e+00 : f32
    %26 = vector.shape_cast %25 : vector<1x128xi1> to vector<1x128xi1>
    %27 = vector.broadcast %26 : vector<1x128xi1> to vector<16x128xi1>
    %28 = vector.broadcast %cst : f32 to vector<16x128xf32>
    %29 = arith.select %27, %23, %28 : vector<16x128xi1>, vector<16x128xf32>
    %30 = vector.extract_strided_slice %20 {offsets = [0, 127], sizes = [16, 1], strides = [1, 1]} : vector<16x128xf32> to vector<16x1xf32>
    %31 = vector.extract_strided_slice %20 {offsets = [0, 0], sizes = [16, 127], strides = [1, 1]} : vector<16x128xf32> to vector<16x127xf32>
    %32 = tpu.concatenate %30, %31 in 1 : vector<16x1xf32>, vector<16x127xf32> -> vector<16x128xf32>
    %c1_i32_9 = arith.constant 1 : i32
    %33 = vector.broadcast %c1_i32_9 : i32 to vector<1x128xi32>
    %34 = arith.cmpi sge, %16, %33 : vector<1x128xi32>
    %cst_10 = arith.constant 0.000000e+00 : f32
    %35 = vector.shape_cast %34 : vector<1x128xi1> to vector<1x128xi1>
    %36 = vector.broadcast %35 : vector<1x128xi1> to vector<16x128xi1>
    %37 = vector.broadcast %cst_10 : f32 to vector<16x128xf32>
    %38 = arith.select %36, %32, %37 : vector<16x128xi1>, vector<16x128xf32>
    %39 = vector.extract_strided_slice %20 {offsets = [0, 1], sizes = [16, 127], strides = [1, 1]} : vector<16x128xf32> to vector<16x127xf32>
    %40 = vector.extract_strided_slice %20 {offsets = [0, 0], sizes = [16, 1], strides = [1, 1]} : vector<16x128xf32> to vector<16x1xf32>
    %41 = tpu.concatenate %39, %40 in 1 : vector<16x127xf32>, vector<16x1xf32> -> vector<16x128xf32>
    %c15_i32 = arith.constant 15 : i32
    %42 = vector.broadcast %c15_i32 : i32 to vector<1x128xi32>
    %43 = arith.cmpi slt, %16, %42 : vector<1x128xi32>
    %cst_11 = arith.constant 0.000000e+00 : f32
    %44 = vector.shape_cast %43 : vector<1x128xi1> to vector<1x128xi1>
    %45 = vector.broadcast %44 : vector<1x128xi1> to vector<16x128xi1>
    %46 = vector.broadcast %cst_11 : f32 to vector<16x128xf32>
    %47 = arith.select %45, %41, %46 : vector<16x128xi1>, vector<16x128xf32>
    %48 = vector.extract_strided_slice %20 {offsets = [0, 2], sizes = [16, 126], strides = [1, 1]} : vector<16x128xf32> to vector<16x126xf32>
    %49 = vector.extract_strided_slice %20 {offsets = [0, 0], sizes = [16, 2], strides = [1, 1]} : vector<16x128xf32> to vector<16x2xf32>
    %50 = tpu.concatenate %48, %49 in 1 : vector<16x126xf32>, vector<16x2xf32> -> vector<16x128xf32>
    %c14_i32 = arith.constant 14 : i32
    %51 = vector.broadcast %c14_i32 : i32 to vector<1x128xi32>
    %52 = arith.cmpi slt, %16, %51 : vector<1x128xi32>
    %cst_12 = arith.constant 0.000000e+00 : f32
    %53 = vector.shape_cast %52 : vector<1x128xi1> to vector<1x128xi1>
    %54 = vector.broadcast %53 : vector<1x128xi1> to vector<16x128xi1>
    %55 = vector.broadcast %cst_12 : f32 to vector<16x128xf32>
    %56 = arith.select %54, %50, %55 : vector<16x128xi1>, vector<16x128xf32>
    %57 = tpu.concatenate %29, %38, %20, %47, %56 in 0 : vector<16x128xf32>, vector<16x128xf32>, vector<16x128xf32>, vector<16x128xf32>, vector<16x128xf32> -> vector<80x128xf32>
    %c0_13 = arith.constant 0 : index
    %c0_14 = arith.constant 0 : index
    %c0_15 = arith.constant 0 : index
    %c0_16 = arith.constant 0 : index
    %58 = vector.load %arg3[%c0_13, %c0_14, %c0_15, %c0_16] : memref<4x3x16x1xf32, #tpu.memory_space<vmem>>, vector<1x3x16x1xf32>
    %59 = vector.shape_cast %58 : vector<1x3x16x1xf32> to vector<3x16x1xf32>
    %c0_17 = arith.constant 0 : index
    %c0_18 = arith.constant 0 : index
    %c0_19 = arith.constant 0 : index
    %60 = vector.load %arg2[%c0_17, %c0_18, %c0_19] : memref<4x16x80xf32, #tpu.memory_space<vmem>>, vector<1x16x80xf32>
    %61 = vector.shape_cast %60 : vector<1x16x80xf32> to vector<16x80xf32>
    %cst_20 = arith.constant dense<0.000000e+00> : vector<16x128xf32>
    %62 = tpu.matmul %61, %57, %cst_20 {dimension_numbers = #tpu.dot_dimension_numbers<[1], [0], [0], [1], [0, 0, 1, 1], [], []>} : vector<16x80xf32>, vector<80x128xf32>, vector<16x128xf32> -> vector<16x128xf32>
    %63 = vector.extract_strided_slice %59 {offsets = [0, 0, 0], sizes = [1, 16, 1], strides = [1, 1, 1]} : vector<3x16x1xf32> to vector<1x16x1xf32>
    %64 = vector.shape_cast %63 : vector<1x16x1xf32> to vector<16x1xf32>
    %65 = vector.broadcast %64 : vector<16x1xf32> to vector<16x128xf32>
    %66 = arith.addf %62, %65 : vector<16x128xf32>
    %67 = arith.mulf %66, %66 : vector<16x128xf32>
    %68 = tpu.concatenate %66, %67 in 0 : vector<16x128xf32>, vector<16x128xf32> -> vector<32x128xf32>
    %cst_21 = arith.constant dense<0.000000e+00> : vector<32x128xf32>
    %69 = tpu.matmul %68, %17, %cst_21 {dimension_numbers = #tpu.dot_dimension_numbers<[1], [0], [0], [1], [0, 0, 1, 1], [], []>} : vector<32x128xf32>, vector<128x128xf32>, vector<32x128xf32> -> vector<32x128xf32>
    %cst_22 = arith.constant dense<0.000000e+00> : vector<32x128xf32>
    %70 = tpu.matmul %18, %69, %cst_22 {dimension_numbers = #tpu.dot_dimension_numbers<[1], [0], [0], [1], [0, 0, 1, 1], [], []>} : vector<32x32xf32>, vector<32x128xf32>, vector<32x128xf32> -> vector<32x128xf32>
    %cst_23 = arith.constant 3.125000e-02 : f32
    %71 = vector.broadcast %cst_23 : f32 to vector<32x128xf32>
    %72 = arith.mulf %70, %71 : vector<32x128xf32>
    %73 = vector.extract_strided_slice %72 {offsets = [0, 0], sizes = [16, 128], strides = [1, 1]} : vector<32x128xf32> to vector<16x128xf32>
    %74 = vector.extract_strided_slice %72 {offsets = [16, 0], sizes = [16, 128], strides = [1, 1]} : vector<32x128xf32> to vector<16x128xf32>
    %75 = arith.mulf %73, %73 : vector<16x128xf32>
    %76 = arith.subf %74, %75 : vector<16x128xf32>
    %cst_24 = arith.constant 0.000000e+00 : f32
    %77 = vector.broadcast %cst_24 : f32 to vector<16x128xf32>
    %78 = arith.maximumf %76, %77 : vector<16x128xf32>
    %79 = arith.subf %66, %73 : vector<16x128xf32>
    %cst_25 = arith.constant 9.99999974E-6 : f32
    %80 = vector.broadcast %cst_25 : f32 to vector<16x128xf32>
    %81 = arith.addf %78, %80 : vector<16x128xf32>
    %82 = math.rsqrt %81 : vector<16x128xf32>
    %83 = arith.mulf %79, %82 : vector<16x128xf32>
    %84 = vector.extract_strided_slice %59 {offsets = [1, 0, 0], sizes = [1, 16, 1], strides = [1, 1, 1]} : vector<3x16x1xf32> to vector<1x16x1xf32>
    %85 = vector.shape_cast %84 : vector<1x16x1xf32> to vector<16x1xf32>
    %86 = vector.broadcast %85 : vector<16x1xf32> to vector<16x128xf32>
    %87 = arith.mulf %83, %86 : vector<16x128xf32>
    %88 = vector.extract_strided_slice %59 {offsets = [2, 0, 0], sizes = [1, 16, 1], strides = [1, 1, 1]} : vector<3x16x1xf32> to vector<1x16x1xf32>
    %89 = vector.shape_cast %88 : vector<1x16x1xf32> to vector<16x1xf32>
    %90 = vector.broadcast %89 : vector<16x1xf32> to vector<16x128xf32>
    %91 = arith.addf %87, %90 : vector<16x128xf32>
    %cst_26 = arith.constant 2.000000e+01 : f32
    %92 = vector.broadcast %cst_26 : f32 to vector<16x128xf32>
    %93 = arith.minimumf %91, %92 : vector<16x128xf32>
    %94 = math.exp %93 : vector<16x128xf32>
    %cst_27 = arith.constant 2.000000e+00 : f32
    %95 = vector.broadcast %cst_27 : f32 to vector<16x128xf32>
    %96 = arith.addf %94, %95 : vector<16x128xf32>
    %97 = arith.mulf %94, %96 : vector<16x128xf32>
    %cst_28 = arith.constant 2.000000e+00 : f32
    %98 = vector.broadcast %cst_28 : f32 to vector<16x128xf32>
    %99 = arith.addf %97, %98 : vector<16x128xf32>
    %100 = arith.divf %97, %99 : vector<16x128xf32>
    %101 = arith.mulf %91, %100 : vector<16x128xf32>
    %102 = vector.extract_strided_slice %101 {offsets = [0, 126], sizes = [16, 2], strides = [1, 1]} : vector<16x128xf32> to vector<16x2xf32>
    %103 = vector.extract_strided_slice %101 {offsets = [0, 0], sizes = [16, 126], strides = [1, 1]} : vector<16x128xf32> to vector<16x126xf32>
    %104 = tpu.concatenate %102, %103 in 1 : vector<16x2xf32>, vector<16x126xf32> -> vector<16x128xf32>
    %c2_i32_29 = arith.constant 2 : i32
    %105 = vector.broadcast %c2_i32_29 : i32 to vector<1x128xi32>
    %106 = arith.cmpi sge, %16, %105 : vector<1x128xi32>
    %cst_30 = arith.constant 0.000000e+00 : f32
    %107 = vector.shape_cast %106 : vector<1x128xi1> to vector<1x128xi1>
    %108 = vector.broadcast %107 : vector<1x128xi1> to vector<16x128xi1>
    %109 = vector.broadcast %cst_30 : f32 to vector<16x128xf32>
    %110 = arith.select %108, %104, %109 : vector<16x128xi1>, vector<16x128xf32>
    %111 = vector.extract_strided_slice %101 {offsets = [0, 127], sizes = [16, 1], strides = [1, 1]} : vector<16x128xf32> to vector<16x1xf32>
    %112 = vector.extract_strided_slice %101 {offsets = [0, 0], sizes = [16, 127], strides = [1, 1]} : vector<16x128xf32> to vector<16x127xf32>
    %113 = tpu.concatenate %111, %112 in 1 : vector<16x1xf32>, vector<16x127xf32> -> vector<16x128xf32>
    %c1_i32_31 = arith.constant 1 : i32
    %114 = vector.broadcast %c1_i32_31 : i32 to vector<1x128xi32>
    %115 = arith.cmpi sge, %16, %114 : vector<1x128xi32>
    %cst_32 = arith.constant 0.000000e+00 : f32
    %116 = vector.shape_cast %115 : vector<1x128xi1> to vector<1x128xi1>
    %117 = vector.broadcast %116 : vector<1x128xi1> to vector<16x128xi1>
    %118 = vector.broadcast %cst_32 : f32 to vector<16x128xf32>
    %119 = arith.select %117, %113, %118 : vector<16x128xi1>, vector<16x128xf32>
    %120 = vector.extract_strided_slice %101 {offsets = [0, 1], sizes = [16, 127], strides = [1, 1]} : vector<16x128xf32> to vector<16x127xf32>
    %121 = vector.extract_strided_slice %101 {offsets = [0, 0], sizes = [16, 1], strides = [1, 1]} : vector<16x128xf32> to vector<16x1xf32>
    %122 = tpu.concatenate %120, %121 in 1 : vector<16x127xf32>, vector<16x1xf32> -> vector<16x128xf32>
    %c15_i32_33 = arith.constant 15 : i32
    %123 = vector.broadcast %c15_i32_33 : i32 to vector<1x128xi32>
    %124 = arith.cmpi slt, %16, %123 : vector<1x128xi32>
    %cst_34 = arith.constant 0.000000e+00 : f32
    %125 = vector.shape_cast %124 : vector<1x128xi1> to vector<1x128xi1>
    %126 = vector.broadcast %125 : vector<1x128xi1> to vector<16x128xi1>
    %127 = vector.broadcast %cst_34 : f32 to vector<16x128xf32>
    %128 = arith.select %126, %122, %127 : vector<16x128xi1>, vector<16x128xf32>
    %129 = vector.extract_strided_slice %101 {offsets = [0, 2], sizes = [16, 126], strides = [1, 1]} : vector<16x128xf32> to vector<16x126xf32>
    %130 = vector.extract_strided_slice %101 {offsets = [0, 0], sizes = [16, 2], strides = [1, 1]} : vector<16x128xf32> to vector<16x2xf32>
    %131 = tpu.concatenate %129, %130 in 1 : vector<16x126xf32>, vector<16x2xf32> -> vector<16x128xf32>
    %c14_i32_35 = arith.constant 14 : i32
    %132 = vector.broadcast %c14_i32_35 : i32 to vector<1x128xi32>
    %133 = arith.cmpi slt, %16, %132 : vector<1x128xi32>
    %cst_36 = arith.constant 0.000000e+00 : f32
    %134 = vector.shape_cast %133 : vector<1x128xi1> to vector<1x128xi1>
    %135 = vector.broadcast %134 : vector<1x128xi1> to vector<16x128xi1>
    %136 = vector.broadcast %cst_36 : f32 to vector<16x128xf32>
    %137 = arith.select %135, %131, %136 : vector<16x128xi1>, vector<16x128xf32>
    %138 = tpu.concatenate %110, %119, %101, %128, %137 in 0 : vector<16x128xf32>, vector<16x128xf32>, vector<16x128xf32>, vector<16x128xf32>, vector<16x128xf32> -> vector<80x128xf32>
    %c1 = arith.constant 1 : index
    %c0_37 = arith.constant 0 : index
    %c0_38 = arith.constant 0 : index
    %c0_39 = arith.constant 0 : index
    %139 = vector.load %arg3[%c1, %c0_37, %c0_38, %c0_39] : memref<4x3x16x1xf32, #tpu.memory_space<vmem>>, vector<1x3x16x1xf32>
    %140 = vector.shape_cast %139 : vector<1x3x16x1xf32> to vector<3x16x1xf32>
    %c1_40 = arith.constant 1 : index
    %c0_41 = arith.constant 0 : index
    %c0_42 = arith.constant 0 : index
    %141 = vector.load %arg2[%c1_40, %c0_41, %c0_42] : memref<4x16x80xf32, #tpu.memory_space<vmem>>, vector<1x16x80xf32>
    %142 = vector.shape_cast %141 : vector<1x16x80xf32> to vector<16x80xf32>
    %cst_43 = arith.constant dense<0.000000e+00> : vector<16x128xf32>
    %143 = tpu.matmul %142, %138, %cst_43 {dimension_numbers = #tpu.dot_dimension_numbers<[1], [0], [0], [1], [0, 0, 1, 1], [], []>} : vector<16x80xf32>, vector<80x128xf32>, vector<16x128xf32> -> vector<16x128xf32>
    %144 = vector.extract_strided_slice %140 {offsets = [0, 0, 0], sizes = [1, 16, 1], strides = [1, 1, 1]} : vector<3x16x1xf32> to vector<1x16x1xf32>
    %145 = vector.shape_cast %144 : vector<1x16x1xf32> to vector<16x1xf32>
    %146 = vector.broadcast %145 : vector<16x1xf32> to vector<16x128xf32>
    %147 = arith.addf %143, %146 : vector<16x128xf32>
    %148 = arith.mulf %147, %147 : vector<16x128xf32>
    %149 = tpu.concatenate %147, %148 in 0 : vector<16x128xf32>, vector<16x128xf32> -> vector<32x128xf32>
    %cst_44 = arith.constant dense<0.000000e+00> : vector<32x128xf32>
    %150 = tpu.matmul %149, %17, %cst_44 {dimension_numbers = #tpu.dot_dimension_numbers<[1], [0], [0], [1], [0, 0, 1, 1], [], []>} : vector<32x128xf32>, vector<128x128xf32>, vector<32x128xf32> -> vector<32x128xf32>
    %cst_45 = arith.constant dense<0.000000e+00> : vector<32x128xf32>
    %151 = tpu.matmul %18, %150, %cst_45 {dimension_numbers = #tpu.dot_dimension_numbers<[1], [0], [0], [1], [0, 0, 1, 1], [], []>} : vector<32x32xf32>, vector<32x128xf32>, vector<32x128xf32> -> vector<32x128xf32>
    %cst_46 = arith.constant 3.125000e-02 : f32
    %152 = vector.broadcast %cst_46 : f32 to vector<32x128xf32>
    %153 = arith.mulf %151, %152 : vector<32x128xf32>
    %154 = vector.extract_strided_slice %153 {offsets = [0, 0], sizes = [16, 128], strides = [1, 1]} : vector<32x128xf32> to vector<16x128xf32>
    %155 = vector.extract_strided_slice %153 {offsets = [16, 0], sizes = [16, 128], strides = [1, 1]} : vector<32x128xf32> to vector<16x128xf32>
    %156 = arith.mulf %154, %154 : vector<16x128xf32>
    %157 = arith.subf %155, %156 : vector<16x128xf32>
    %cst_47 = arith.constant 0.000000e+00 : f32
    %158 = vector.broadcast %cst_47 : f32 to vector<16x128xf32>
    %159 = arith.maximumf %157, %158 : vector<16x128xf32>
    %160 = arith.subf %147, %154 : vector<16x128xf32>
    %cst_48 = arith.constant 9.99999974E-6 : f32
    %161 = vector.broadcast %cst_48 : f32 to vector<16x128xf32>
    %162 = arith.addf %159, %161 : vector<16x128xf32>
    %163 = math.rsqrt %162 : vector<16x128xf32>
    %164 = arith.mulf %160, %163 : vector<16x128xf32>
    %165 = vector.extract_strided_slice %140 {offsets = [1, 0, 0], sizes = [1, 16, 1], strides = [1, 1, 1]} : vector<3x16x1xf32> to vector<1x16x1xf32>
    %166 = vector.shape_cast %165 : vector<1x16x1xf32> to vector<16x1xf32>
    %167 = vector.broadcast %166 : vector<16x1xf32> to vector<16x128xf32>
    %168 = arith.mulf %164, %167 : vector<16x128xf32>
    %169 = vector.extract_strided_slice %140 {offsets = [2, 0, 0], sizes = [1, 16, 1], strides = [1, 1, 1]} : vector<3x16x1xf32> to vector<1x16x1xf32>
    %170 = vector.shape_cast %169 : vector<1x16x1xf32> to vector<16x1xf32>
    %171 = vector.broadcast %170 : vector<16x1xf32> to vector<16x128xf32>
    %172 = arith.addf %168, %171 : vector<16x128xf32>
    %cst_49 = arith.constant 2.000000e+01 : f32
    %173 = vector.broadcast %cst_49 : f32 to vector<16x128xf32>
    %174 = arith.minimumf %172, %173 : vector<16x128xf32>
    %175 = math.exp %174 : vector<16x128xf32>
    %cst_50 = arith.constant 2.000000e+00 : f32
    %176 = vector.broadcast %cst_50 : f32 to vector<16x128xf32>
    %177 = arith.addf %175, %176 : vector<16x128xf32>
    %178 = arith.mulf %175, %177 : vector<16x128xf32>
    %cst_51 = arith.constant 2.000000e+00 : f32
    %179 = vector.broadcast %cst_51 : f32 to vector<16x128xf32>
    %180 = arith.addf %178, %179 : vector<16x128xf32>
    %181 = arith.divf %178, %180 : vector<16x128xf32>
    %182 = arith.mulf %172, %181 : vector<16x128xf32>
    %c0_52 = arith.constant 0 : index
    %c0_53 = arith.constant 0 : index
    %183 = vector.load %arg4[%c0_52, %c0_53] : memref<16x16xf32, #tpu.memory_space<vmem>>, vector<16x16xf32>
    %cst_54 = arith.constant dense<0.000000e+00> : vector<16x128xf32>
    %184 = tpu.matmul %183, %20, %cst_54 {dimension_numbers = #tpu.dot_dimension_numbers<[1], [0], [0], [1], [0, 0, 1, 1], [], []>} : vector<16x16xf32>, vector<16x128xf32>, vector<16x128xf32> -> vector<16x128xf32>
    %185 = arith.addf %182, %184 : vector<16x128xf32>
    %c0_55 = arith.constant 0 : index
    %c0_56 = arith.constant 0 : index
    %186 = vector.load %arg5[%c0_55, %c0_56] : memref<16x1xf32, #tpu.memory_space<vmem>>, vector<16x1xf32>
    %187 = vector.broadcast %186 : vector<16x1xf32> to vector<16x128xf32>
    %188 = arith.addf %185, %187 : vector<16x128xf32>
    %189 = vector.extract_strided_slice %188 {offsets = [0, 126], sizes = [16, 2], strides = [1, 1]} : vector<16x128xf32> to vector<16x2xf32>
    %190 = vector.extract_strided_slice %188 {offsets = [0, 0], sizes = [16, 126], strides = [1, 1]} : vector<16x128xf32> to vector<16x126xf32>
    %191 = tpu.concatenate %189, %190 in 1 : vector<16x2xf32>, vector<16x126xf32> -> vector<16x128xf32>
    %c2_i32_57 = arith.constant 2 : i32
    %192 = vector.broadcast %c2_i32_57 : i32 to vector<1x128xi32>
    %193 = arith.cmpi sge, %16, %192 : vector<1x128xi32>
    %cst_58 = arith.constant 0.000000e+00 : f32
    %194 = vector.shape_cast %193 : vector<1x128xi1> to vector<1x128xi1>
    %195 = vector.broadcast %194 : vector<1x128xi1> to vector<16x128xi1>
    %196 = vector.broadcast %cst_58 : f32 to vector<16x128xf32>
    %197 = arith.select %195, %191, %196 : vector<16x128xi1>, vector<16x128xf32>
    %198 = vector.extract_strided_slice %188 {offsets = [0, 127], sizes = [16, 1], strides = [1, 1]} : vector<16x128xf32> to vector<16x1xf32>
    %199 = vector.extract_strided_slice %188 {offsets = [0, 0], sizes = [16, 127], strides = [1, 1]} : vector<16x128xf32> to vector<16x127xf32>
    %200 = tpu.concatenate %198, %199 in 1 : vector<16x1xf32>, vector<16x127xf32> -> vector<16x128xf32>
    %c1_i32_59 = arith.constant 1 : i32
    %201 = vector.broadcast %c1_i32_59 : i32 to vector<1x128xi32>
    %202 = arith.cmpi sge, %16, %201 : vector<1x128xi32>
    %cst_60 = arith.constant 0.000000e+00 : f32
    %203 = vector.shape_cast %202 : vector<1x128xi1> to vector<1x128xi1>
    %204 = vector.broadcast %203 : vector<1x128xi1> to vector<16x128xi1>
    %205 = vector.broadcast %cst_60 : f32 to vector<16x128xf32>
    %206 = arith.select %204, %200, %205 : vector<16x128xi1>, vector<16x128xf32>
    %207 = vector.extract_strided_slice %188 {offsets = [0, 1], sizes = [16, 127], strides = [1, 1]} : vector<16x128xf32> to vector<16x127xf32>
    %208 = vector.extract_strided_slice %188 {offsets = [0, 0], sizes = [16, 1], strides = [1, 1]} : vector<16x128xf32> to vector<16x1xf32>
    %209 = tpu.concatenate %207, %208 in 1 : vector<16x127xf32>, vector<16x1xf32> -> vector<16x128xf32>
    %c15_i32_61 = arith.constant 15 : i32
    %210 = vector.broadcast %c15_i32_61 : i32 to vector<1x128xi32>
    %211 = arith.cmpi slt, %16, %210 : vector<1x128xi32>
    %cst_62 = arith.constant 0.000000e+00 : f32
    %212 = vector.shape_cast %211 : vector<1x128xi1> to vector<1x128xi1>
    %213 = vector.broadcast %212 : vector<1x128xi1> to vector<16x128xi1>
    %214 = vector.broadcast %cst_62 : f32 to vector<16x128xf32>
    %215 = arith.select %213, %209, %214 : vector<16x128xi1>, vector<16x128xf32>
    %216 = vector.extract_strided_slice %188 {offsets = [0, 2], sizes = [16, 126], strides = [1, 1]} : vector<16x128xf32> to vector<16x126xf32>
    %217 = vector.extract_strided_slice %188 {offsets = [0, 0], sizes = [16, 2], strides = [1, 1]} : vector<16x128xf32> to vector<16x2xf32>
    %218 = tpu.concatenate %216, %217 in 1 : vector<16x126xf32>, vector<16x2xf32> -> vector<16x128xf32>
    %c14_i32_63 = arith.constant 14 : i32
    %219 = vector.broadcast %c14_i32_63 : i32 to vector<1x128xi32>
    %220 = arith.cmpi slt, %16, %219 : vector<1x128xi32>
    %cst_64 = arith.constant 0.000000e+00 : f32
    %221 = vector.shape_cast %220 : vector<1x128xi1> to vector<1x128xi1>
    %222 = vector.broadcast %221 : vector<1x128xi1> to vector<16x128xi1>
    %223 = vector.broadcast %cst_64 : f32 to vector<16x128xf32>
    %224 = arith.select %222, %218, %223 : vector<16x128xi1>, vector<16x128xf32>
    %225 = tpu.concatenate %197, %206, %188, %215, %224 in 0 : vector<16x128xf32>, vector<16x128xf32>, vector<16x128xf32>, vector<16x128xf32>, vector<16x128xf32> -> vector<80x128xf32>
    %c2 = arith.constant 2 : index
    %c0_65 = arith.constant 0 : index
    %c0_66 = arith.constant 0 : index
    %c0_67 = arith.constant 0 : index
    %226 = vector.load %arg3[%c2, %c0_65, %c0_66, %c0_67] : memref<4x3x16x1xf32, #tpu.memory_space<vmem>>, vector<1x3x16x1xf32>
    %227 = vector.shape_cast %226 : vector<1x3x16x1xf32> to vector<3x16x1xf32>
    %c2_68 = arith.constant 2 : index
    %c0_69 = arith.constant 0 : index
    %c0_70 = arith.constant 0 : index
    %228 = vector.load %arg2[%c2_68, %c0_69, %c0_70] : memref<4x16x80xf32, #tpu.memory_space<vmem>>, vector<1x16x80xf32>
    %229 = vector.shape_cast %228 : vector<1x16x80xf32> to vector<16x80xf32>
    %cst_71 = arith.constant dense<0.000000e+00> : vector<16x128xf32>
    %230 = tpu.matmul %229, %225, %cst_71 {dimension_numbers = #tpu.dot_dimension_numbers<[1], [0], [0], [1], [0, 0, 1, 1], [], []>} : vector<16x80xf32>, vector<80x128xf32>, vector<16x128xf32> -> vector<16x128xf32>
    %231 = vector.extract_strided_slice %227 {offsets = [0, 0, 0], sizes = [1, 16, 1], strides = [1, 1, 1]} : vector<3x16x1xf32> to vector<1x16x1xf32>
    %232 = vector.shape_cast %231 : vector<1x16x1xf32> to vector<16x1xf32>
    %233 = vector.broadcast %232 : vector<16x1xf32> to vector<16x128xf32>
    %234 = arith.addf %230, %233 : vector<16x128xf32>
    %235 = arith.mulf %234, %234 : vector<16x128xf32>
    %236 = tpu.concatenate %234, %235 in 0 : vector<16x128xf32>, vector<16x128xf32> -> vector<32x128xf32>
    %cst_72 = arith.constant dense<0.000000e+00> : vector<32x128xf32>
    %237 = tpu.matmul %236, %17, %cst_72 {dimension_numbers = #tpu.dot_dimension_numbers<[1], [0], [0], [1], [0, 0, 1, 1], [], []>} : vector<32x128xf32>, vector<128x128xf32>, vector<32x128xf32> -> vector<32x128xf32>
    %cst_73 = arith.constant dense<0.000000e+00> : vector<32x128xf32>
    %238 = tpu.matmul %18, %237, %cst_73 {dimension_numbers = #tpu.dot_dimension_numbers<[1], [0], [0], [1], [0, 0, 1, 1], [], []>} : vector<32x32xf32>, vector<32x128xf32>, vector<32x128xf32> -> vector<32x128xf32>
    %cst_74 = arith.constant 3.125000e-02 : f32
    %239 = vector.broadcast %cst_74 : f32 to vector<32x128xf32>
    %240 = arith.mulf %238, %239 : vector<32x128xf32>
    %241 = vector.extract_strided_slice %240 {offsets = [0, 0], sizes = [16, 128], strides = [1, 1]} : vector<32x128xf32> to vector<16x128xf32>
    %242 = vector.extract_strided_slice %240 {offsets = [16, 0], sizes = [16, 128], strides = [1, 1]} : vector<32x128xf32> to vector<16x128xf32>
    %243 = arith.mulf %241, %241 : vector<16x128xf32>
    %244 = arith.subf %242, %243 : vector<16x128xf32>
    %cst_75 = arith.constant 0.000000e+00 : f32
    %245 = vector.broadcast %cst_75 : f32 to vector<16x128xf32>
    %246 = arith.maximumf %244, %245 : vector<16x128xf32>
    %247 = arith.subf %234, %241 : vector<16x128xf32>
    %cst_76 = arith.constant 9.99999974E-6 : f32
    %248 = vector.broadcast %cst_76 : f32 to vector<16x128xf32>
    %249 = arith.addf %246, %248 : vector<16x128xf32>
    %250 = math.rsqrt %249 : vector<16x128xf32>
    %251 = arith.mulf %247, %250 : vector<16x128xf32>
    %252 = vector.extract_strided_slice %227 {offsets = [1, 0, 0], sizes = [1, 16, 1], strides = [1, 1, 1]} : vector<3x16x1xf32> to vector<1x16x1xf32>
    %253 = vector.shape_cast %252 : vector<1x16x1xf32> to vector<16x1xf32>
    %254 = vector.broadcast %253 : vector<16x1xf32> to vector<16x128xf32>
    %255 = arith.mulf %251, %254 : vector<16x128xf32>
    %256 = vector.extract_strided_slice %227 {offsets = [2, 0, 0], sizes = [1, 16, 1], strides = [1, 1, 1]} : vector<3x16x1xf32> to vector<1x16x1xf32>
    %257 = vector.shape_cast %256 : vector<1x16x1xf32> to vector<16x1xf32>
    %258 = vector.broadcast %257 : vector<16x1xf32> to vector<16x128xf32>
    %259 = arith.addf %255, %258 : vector<16x128xf32>
    %cst_77 = arith.constant 2.000000e+01 : f32
    %260 = vector.broadcast %cst_77 : f32 to vector<16x128xf32>
    %261 = arith.minimumf %259, %260 : vector<16x128xf32>
    %262 = math.exp %261 : vector<16x128xf32>
    %cst_78 = arith.constant 2.000000e+00 : f32
    %263 = vector.broadcast %cst_78 : f32 to vector<16x128xf32>
    %264 = arith.addf %262, %263 : vector<16x128xf32>
    %265 = arith.mulf %262, %264 : vector<16x128xf32>
    %cst_79 = arith.constant 2.000000e+00 : f32
    %266 = vector.broadcast %cst_79 : f32 to vector<16x128xf32>
    %267 = arith.addf %265, %266 : vector<16x128xf32>
    %268 = arith.divf %265, %267 : vector<16x128xf32>
    %269 = arith.mulf %259, %268 : vector<16x128xf32>
    %270 = vector.extract_strided_slice %269 {offsets = [0, 126], sizes = [16, 2], strides = [1, 1]} : vector<16x128xf32> to vector<16x2xf32>
    %271 = vector.extract_strided_slice %269 {offsets = [0, 0], sizes = [16, 126], strides = [1, 1]} : vector<16x128xf32> to vector<16x126xf32>
    %272 = tpu.concatenate %270, %271 in 1 : vector<16x2xf32>, vector<16x126xf32> -> vector<16x128xf32>
    %c2_i32_80 = arith.constant 2 : i32
    %273 = vector.broadcast %c2_i32_80 : i32 to vector<1x128xi32>
    %274 = arith.cmpi sge, %16, %273 : vector<1x128xi32>
    %cst_81 = arith.constant 0.000000e+00 : f32
    %275 = vector.shape_cast %274 : vector<1x128xi1> to vector<1x128xi1>
    %276 = vector.broadcast %275 : vector<1x128xi1> to vector<16x128xi1>
    %277 = vector.broadcast %cst_81 : f32 to vector<16x128xf32>
    %278 = arith.select %276, %272, %277 : vector<16x128xi1>, vector<16x128xf32>
    %279 = vector.extract_strided_slice %269 {offsets = [0, 127], sizes = [16, 1], strides = [1, 1]} : vector<16x128xf32> to vector<16x1xf32>
    %280 = vector.extract_strided_slice %269 {offsets = [0, 0], sizes = [16, 127], strides = [1, 1]} : vector<16x128xf32> to vector<16x127xf32>
    %281 = tpu.concatenate %279, %280 in 1 : vector<16x1xf32>, vector<16x127xf32> -> vector<16x128xf32>
    %c1_i32_82 = arith.constant 1 : i32
    %282 = vector.broadcast %c1_i32_82 : i32 to vector<1x128xi32>
    %283 = arith.cmpi sge, %16, %282 : vector<1x128xi32>
    %cst_83 = arith.constant 0.000000e+00 : f32
    %284 = vector.shape_cast %283 : vector<1x128xi1> to vector<1x128xi1>
    %285 = vector.broadcast %284 : vector<1x128xi1> to vector<16x128xi1>
    %286 = vector.broadcast %cst_83 : f32 to vector<16x128xf32>
    %287 = arith.select %285, %281, %286 : vector<16x128xi1>, vector<16x128xf32>
    %288 = vector.extract_strided_slice %269 {offsets = [0, 1], sizes = [16, 127], strides = [1, 1]} : vector<16x128xf32> to vector<16x127xf32>
    %289 = vector.extract_strided_slice %269 {offsets = [0, 0], sizes = [16, 1], strides = [1, 1]} : vector<16x128xf32> to vector<16x1xf32>
    %290 = tpu.concatenate %288, %289 in 1 : vector<16x127xf32>, vector<16x1xf32> -> vector<16x128xf32>
    %c15_i32_84 = arith.constant 15 : i32
    %291 = vector.broadcast %c15_i32_84 : i32 to vector<1x128xi32>
    %292 = arith.cmpi slt, %16, %291 : vector<1x128xi32>
    %cst_85 = arith.constant 0.000000e+00 : f32
    %293 = vector.shape_cast %292 : vector<1x128xi1> to vector<1x128xi1>
    %294 = vector.broadcast %293 : vector<1x128xi1> to vector<16x128xi1>
    %295 = vector.broadcast %cst_85 : f32 to vector<16x128xf32>
    %296 = arith.select %294, %290, %295 : vector<16x128xi1>, vector<16x128xf32>
    %297 = vector.extract_strided_slice %269 {offsets = [0, 2], sizes = [16, 126], strides = [1, 1]} : vector<16x128xf32> to vector<16x126xf32>
    %298 = vector.extract_strided_slice %269 {offsets = [0, 0], sizes = [16, 2], strides = [1, 1]} : vector<16x128xf32> to vector<16x2xf32>
    %299 = tpu.concatenate %297, %298 in 1 : vector<16x126xf32>, vector<16x2xf32> -> vector<16x128xf32>
    %c14_i32_86 = arith.constant 14 : i32
    %300 = vector.broadcast %c14_i32_86 : i32 to vector<1x128xi32>
    %301 = arith.cmpi slt, %16, %300 : vector<1x128xi32>
    %cst_87 = arith.constant 0.000000e+00 : f32
    %302 = vector.shape_cast %301 : vector<1x128xi1> to vector<1x128xi1>
    %303 = vector.broadcast %302 : vector<1x128xi1> to vector<16x128xi1>
    %304 = vector.broadcast %cst_87 : f32 to vector<16x128xf32>
    %305 = arith.select %303, %299, %304 : vector<16x128xi1>, vector<16x128xf32>
    %306 = tpu.concatenate %278, %287, %269, %296, %305 in 0 : vector<16x128xf32>, vector<16x128xf32>, vector<16x128xf32>, vector<16x128xf32>, vector<16x128xf32> -> vector<80x128xf32>
    %c3 = arith.constant 3 : index
    %c0_88 = arith.constant 0 : index
    %c0_89 = arith.constant 0 : index
    %c0_90 = arith.constant 0 : index
    %307 = vector.load %arg3[%c3, %c0_88, %c0_89, %c0_90] : memref<4x3x16x1xf32, #tpu.memory_space<vmem>>, vector<1x3x16x1xf32>
    %308 = vector.shape_cast %307 : vector<1x3x16x1xf32> to vector<3x16x1xf32>
    %c3_91 = arith.constant 3 : index
    %c0_92 = arith.constant 0 : index
    %c0_93 = arith.constant 0 : index
    %309 = vector.load %arg2[%c3_91, %c0_92, %c0_93] : memref<4x16x80xf32, #tpu.memory_space<vmem>>, vector<1x16x80xf32>
    %310 = vector.shape_cast %309 : vector<1x16x80xf32> to vector<16x80xf32>
    %cst_94 = arith.constant dense<0.000000e+00> : vector<16x128xf32>
    %311 = tpu.matmul %310, %306, %cst_94 {dimension_numbers = #tpu.dot_dimension_numbers<[1], [0], [0], [1], [0, 0, 1, 1], [], []>} : vector<16x80xf32>, vector<80x128xf32>, vector<16x128xf32> -> vector<16x128xf32>
    %312 = vector.extract_strided_slice %308 {offsets = [0, 0, 0], sizes = [1, 16, 1], strides = [1, 1, 1]} : vector<3x16x1xf32> to vector<1x16x1xf32>
    %313 = vector.shape_cast %312 : vector<1x16x1xf32> to vector<16x1xf32>
    %314 = vector.broadcast %313 : vector<16x1xf32> to vector<16x128xf32>
    %315 = arith.addf %311, %314 : vector<16x128xf32>
    %316 = arith.mulf %315, %315 : vector<16x128xf32>
    %317 = tpu.concatenate %315, %316 in 0 : vector<16x128xf32>, vector<16x128xf32> -> vector<32x128xf32>
    %cst_95 = arith.constant dense<0.000000e+00> : vector<32x128xf32>
    %318 = tpu.matmul %317, %17, %cst_95 {dimension_numbers = #tpu.dot_dimension_numbers<[1], [0], [0], [1], [0, 0, 1, 1], [], []>} : vector<32x128xf32>, vector<128x128xf32>, vector<32x128xf32> -> vector<32x128xf32>
    %cst_96 = arith.constant dense<0.000000e+00> : vector<32x128xf32>
    %319 = tpu.matmul %18, %318, %cst_96 {dimension_numbers = #tpu.dot_dimension_numbers<[1], [0], [0], [1], [0, 0, 1, 1], [], []>} : vector<32x32xf32>, vector<32x128xf32>, vector<32x128xf32> -> vector<32x128xf32>
    %cst_97 = arith.constant 3.125000e-02 : f32
    %320 = vector.broadcast %cst_97 : f32 to vector<32x128xf32>
    %321 = arith.mulf %319, %320 : vector<32x128xf32>
    %322 = vector.extract_strided_slice %321 {offsets = [0, 0], sizes = [16, 128], strides = [1, 1]} : vector<32x128xf32> to vector<16x128xf32>
    %323 = vector.extract_strided_slice %321 {offsets = [16, 0], sizes = [16, 128], strides = [1, 1]} : vector<32x128xf32> to vector<16x128xf32>
    %324 = arith.mulf %322, %322 : vector<16x128xf32>
    %325 = arith.subf %323, %324 : vector<16x128xf32>
    %cst_98 = arith.constant 0.000000e+00 : f32
    %326 = vector.broadcast %cst_98 : f32 to vector<16x128xf32>
    %327 = arith.maximumf %325, %326 : vector<16x128xf32>
    %328 = arith.subf %315, %322 : vector<16x128xf32>
    %cst_99 = arith.constant 9.99999974E-6 : f32
    %329 = vector.broadcast %cst_99 : f32 to vector<16x128xf32>
    %330 = arith.addf %327, %329 : vector<16x128xf32>
    %331 = math.rsqrt %330 : vector<16x128xf32>
    %332 = arith.mulf %328, %331 : vector<16x128xf32>
    %333 = vector.extract_strided_slice %308 {offsets = [1, 0, 0], sizes = [1, 16, 1], strides = [1, 1, 1]} : vector<3x16x1xf32> to vector<1x16x1xf32>
    %334 = vector.shape_cast %333 : vector<1x16x1xf32> to vector<16x1xf32>
    %335 = vector.broadcast %334 : vector<16x1xf32> to vector<16x128xf32>
    %336 = arith.mulf %332, %335 : vector<16x128xf32>
    %337 = vector.extract_strided_slice %308 {offsets = [2, 0, 0], sizes = [1, 16, 1], strides = [1, 1, 1]} : vector<3x16x1xf32> to vector<1x16x1xf32>
    %338 = vector.shape_cast %337 : vector<1x16x1xf32> to vector<16x1xf32>
    %339 = vector.broadcast %338 : vector<16x1xf32> to vector<16x128xf32>
    %340 = arith.addf %336, %339 : vector<16x128xf32>
    %cst_100 = arith.constant 2.000000e+01 : f32
    %341 = vector.broadcast %cst_100 : f32 to vector<16x128xf32>
    %342 = arith.minimumf %340, %341 : vector<16x128xf32>
    %343 = math.exp %342 : vector<16x128xf32>
    %cst_101 = arith.constant 2.000000e+00 : f32
    %344 = vector.broadcast %cst_101 : f32 to vector<16x128xf32>
    %345 = arith.addf %343, %344 : vector<16x128xf32>
    %346 = arith.mulf %343, %345 : vector<16x128xf32>
    %cst_102 = arith.constant 2.000000e+00 : f32
    %347 = vector.broadcast %cst_102 : f32 to vector<16x128xf32>
    %348 = arith.addf %346, %347 : vector<16x128xf32>
    %349 = arith.divf %346, %348 : vector<16x128xf32>
    %350 = arith.mulf %340, %349 : vector<16x128xf32>
    %351 = arith.addf %350, %188 : vector<16x128xf32>
    %352 = vector.extract_strided_slice %351 {offsets = [0, 127], sizes = [16, 1], strides = [1, 1]} : vector<16x128xf32> to vector<16x1xf32>
    %353 = vector.extract_strided_slice %351 {offsets = [0, 0], sizes = [16, 127], strides = [1, 1]} : vector<16x128xf32> to vector<16x127xf32>
    %354 = tpu.concatenate %352, %353 in 1 : vector<16x1xf32>, vector<16x127xf32> -> vector<16x128xf32>
    %c1_i32_103 = arith.constant 1 : i32
    %355 = vector.broadcast %c1_i32_103 : i32 to vector<1x128xi32>
    %356 = arith.cmpi sge, %16, %355 : vector<1x128xi32>
    %cst_104 = arith.constant 0.000000e+00 : f32
    %357 = vector.shape_cast %356 : vector<1x128xi1> to vector<1x128xi1>
    %358 = vector.broadcast %357 : vector<1x128xi1> to vector<16x128xi1>
    %359 = vector.broadcast %cst_104 : f32 to vector<16x128xf32>
    %360 = arith.select %358, %354, %359 : vector<16x128xi1>, vector<16x128xf32>
    %361 = vector.extract_strided_slice %351 {offsets = [0, 1], sizes = [16, 127], strides = [1, 1]} : vector<16x128xf32> to vector<16x127xf32>
    %362 = vector.extract_strided_slice %351 {offsets = [0, 0], sizes = [16, 1], strides = [1, 1]} : vector<16x128xf32> to vector<16x1xf32>
    %363 = tpu.concatenate %361, %362 in 1 : vector<16x127xf32>, vector<16x1xf32> -> vector<16x128xf32>
    %c15_i32_105 = arith.constant 15 : i32
    %364 = vector.broadcast %c15_i32_105 : i32 to vector<1x128xi32>
    %365 = arith.cmpi slt, %16, %364 : vector<1x128xi32>
    %cst_106 = arith.constant 0.000000e+00 : f32
    %366 = vector.shape_cast %365 : vector<1x128xi1> to vector<1x128xi1>
    %367 = vector.broadcast %366 : vector<1x128xi1> to vector<16x128xi1>
    %368 = vector.broadcast %cst_106 : f32 to vector<16x128xf32>
    %369 = arith.select %367, %363, %368 : vector<16x128xi1>, vector<16x128xf32>
    %370 = tpu.concatenate %360, %351, %369 in 0 : vector<16x128xf32>, vector<16x128xf32>, vector<16x128xf32> -> vector<48x128xf32>
    %c0_107 = arith.constant 0 : index
    %c0_108 = arith.constant 0 : index
    %371 = vector.load %arg6[%c0_107, %c0_108] : memref<32x48xf32, #tpu.memory_space<vmem>>, vector<32x48xf32>
    %cst_109 = arith.constant dense<0.000000e+00> : vector<32x128xf32>
    %372 = tpu.matmul %371, %370, %cst_109 {dimension_numbers = #tpu.dot_dimension_numbers<[1], [0], [0], [1], [0, 0, 1, 1], [], []>} : vector<32x48xf32>, vector<48x128xf32>, vector<32x128xf32> -> vector<32x128xf32>
    %c0_110 = arith.constant 0 : index
    %c0_111 = arith.constant 0 : index
    %373 = vector.load %arg7[%c0_110, %c0_111] : memref<32x1xf32, #tpu.memory_space<vmem>>, vector<32x1xf32>
    %374 = vector.broadcast %373 : vector<32x1xf32> to vector<32x128xf32>
    %375 = arith.addf %372, %374 : vector<32x128xf32>
    %c0_112 = arith.constant 0 : index
    %c0_113 = arith.constant 0 : index
    %c0_114 = arith.constant 0 : index
    %376 = vector.load %arg10[%c0_112, %c0_113, %c0_114] : memref<1x32x128xf32, #tpu.memory_space<vmem>>, vector<1x32x128xf32>
    %377 = vector.shape_cast %376 : vector<1x32x128xf32> to vector<32x128xf32>
    %378 = vector.shape_cast %375 : vector<32x128xf32> to vector<1x32x128xf32>
    tpu.vector_store %arg10[%c0_112, %c0_113, %c0_114], %378 {strides = array<i32>} : memref<1x32x128xf32, #tpu.memory_space<vmem>>, vector<1x32x128xf32>,
    return
  }
  func.func @transform_0(%arg0: i32) -> (i32, i32, i32) {
    %c0_i32 = arith.constant 0 : i32
    %c0_i32_0 = arith.constant 0 : i32
    %c0_i32_1 = arith.constant 0 : i32
    return %arg0, %c0_i32, %c0_i32_0 : i32, i32, i32
  }
  func.func @transform_1(%arg0: i32) -> (i32, i32, i32) {
    %c0_i32 = arith.constant 0 : i32
    %c0_i32_0 = arith.constant 0 : i32
    %c0_i32_1 = arith.constant 0 : i32
    %c0_i32_2 = arith.constant 0 : i32
    return %c0_i32, %c0_i32_0, %c0_i32_1 : i32, i32, i32
  }
  func.func @transform_2(%arg0: i32) -> (i32, i32, i32, i32) {
    %c0_i32 = arith.constant 0 : i32
    %c0_i32_0 = arith.constant 0 : i32
    %c0_i32_1 = arith.constant 0 : i32
    %c0_i32_2 = arith.constant 0 : i32
    %c0_i32_3 = arith.constant 0 : i32
    return %c0_i32, %c0_i32_0, %c0_i32_1, %c0_i32_2 : i32, i32, i32, i32
  }
  func.func @transform_3(%arg0: i32) -> (i32, i32) {
    %c0_i32 = arith.constant 0 : i32
    %c0_i32_0 = arith.constant 0 : i32
    %c0_i32_1 = arith.constant 0 : i32
    return %c0_i32, %c0_i32_0 : i32, i32
  }
  func.func @transform_4(%arg0: i32) -> (i32, i32) {
    %c0_i32 = arith.constant 0 : i32
    %c0_i32_0 = arith.constant 0 : i32
    %c0_i32_1 = arith.constant 0 : i32
    return %c0_i32, %c0_i32_0 : i32, i32
  }
  func.func @transform_5(%arg0: i32) -> (i32, i32) {
    %c0_i32 = arith.constant 0 : i32
    %c0_i32_0 = arith.constant 0 : i32
    %c0_i32_1 = arith.constant 0 : i32
    return %c0_i32, %c0_i32_0 : i32, i32
  }
  func.func @transform_6(%arg0: i32) -> (i32, i32) {
    %c0_i32 = arith.constant 0 : i32
    %c0_i32_0 = arith.constant 0 : i32
    %c0_i32_1 = arith.constant 0 : i32
    return %c0_i32, %c0_i32_0 : i32, i32
  }
  func.func @transform_7(%arg0: i32) -> (i32, i32) {
    %c0_i32 = arith.constant 0 : i32
    %c0_i32_0 = arith.constant 0 : i32
    %c0_i32_1 = arith.constant 0 : i32
    return %c0_i32, %c0_i32_0 : i32, i32
  }
  func.func @transform_8(%arg0: i32) -> (i32, i32) {
    %c0_i32 = arith.constant 0 : i32
    %c0_i32_0 = arith.constant 0 : i32
    %c0_i32_1 = arith.constant 0 : i32
    return %c0_i32, %c0_i32_0 : i32, i32
  }
  func.func @transform_9(%arg0: i32) -> (i32, i32, i32) {
    %c0_i32 = arith.constant 0 : i32
    %c0_i32_0 = arith.constant 0 : i32
    %c0_i32_1 = arith.constant 0 : i32
    return %arg0, %c0_i32, %c0_i32_0 : i32, i32, i32
  }
}

</mosaic_0001>

<bundles_post_ra>
// kernel: upsampler_fused.1
= control target key start
LH: loop header
LB: loop body
LE: loop exit
PB: predicated region body
PF: predicated region fallthrough
CT: control target
= control target key end

     0   :  { %s2894_s30 = smov 0   ;;  %s3579_s0 = inlined_call_operand.vmem [shape: f32[2,16,128], index: 0, kind: input, shape index: {}]   ;;  %s3580_s1 = inlined_call_operand.vmem [shape: f32[4,16,80], index: 1, kind: input, shape index: {}]   ;;  %s3581_s2 = inlined_call_operand.vmem [shape: f32[4,3,16,1], index: 2, kind: input, shape index: {}]   ;;  %s3582_s3 = inlined_call_operand.vmem [shape: f32[16,16], index: 3, kind: input, shape index: {}]   ;;  %s3583_s4 = inlined_call_operand.vmem [shape: f32[16,1], index: 4, kind: input, shape index: {}]   ;;  %s3584_s5 = inlined_call_operand.vmem [shape: f32[32,48], index: 5, kind: input, shape index: {}]   ;;  %s3585_s6 = inlined_call_operand.vmem [shape: f32[32,1], index: 6, kind: input, shape index: {}]   ;;  %s3586_s7 = inlined_call_operand.vmem [shape: f32[32,32], index: 7, kind: input, shape index: {}]   ;;  %s3587_s8 = inlined_call_operand.vmem [shape: f32[128,128], index: 8, kind: input, shape index: {}]   ;;  %s3588_s9 = inlined_call_operand.vmem [shape: f32[2,32,128], index: 9, kind: output, shape index: {}]  }
   0x1 LB: > { %s2166_s10 = sadd.s32 4294967295, %s2837_s30   ;;  %p2170_p0 = scmp.ge.s32.totalorder %s2837_s30, 1  ;;  %s2837_s30 = sphi %s2894_s30, %s19_s30  }
   0x2   : > { %p287_p1 = scmp.lt.s32.totalorder %s2837_s30, 3 }
   0x4   : > { %p288_p2 = pnand %p2170_p0, %p287_p1 }
   0x5   : > { %p323_p3 = scmp.lt.s32.totalorder (!%p288_p2), %s2166_s10, 1  ;;  %s2839_s15 = smov (!%p288_p2), 126  }
   0x6   : > { %291 = sbr.rel (%p288_p2) target bundleno = 3572 (0xdf4), region = 56  ;;  %s2840_s16 = smov (!%p288_p2), 127  }
   0x7   : > { %s2841_s19 = smov (!%p288_p2), 1   ;;  %s2843_s22 = smov (!%p288_p2), 2  }
   0xb   : > { %s3590_s10 = smov (!%p323_p3, %s2166_s10), 1  ;;  %v421_v2 = vld [vmem:[%s3580_s1] sm:$0xff]  ;;  %vm433_vm0 = vcmask 654336   ;;  %v2842_v3 = vmov 0   ;;  %v2931_v4 = vld [vmem:[%s3587_s8 + $0x78] sm:$0xff]  ;;  %v2940_v5 = vld [vmem:[%s3587_s8 + $0x70] sm:$0xff]  ;;  %v333_v23 = vlaneseq }
   0xc   : > { %s2267_s11 = sshll.u32 %s3590_s10, 4  ;;  %2463 = vmatprep.mubr.msk.f32.mxu0 %vm433_vm0, %v421_v2  ;;  %2781 = vset.pattern.permute.xlu0 %v2842_v3  ;;  %v415_v6 = vld [vmem:[%s3581_s2] sm:$0xff]  ;;  %v416_v7 = vld [vmem:[%s3581_s2 + $0x8] sm:$0xff]  ;;  %v417_v9 = vld [vmem:[%s3581_s2 + $0x10] sm:$0xff]  ;;  %vm602_vm5 = vcmask 261120   ;;  %vm1129_vm6 = vcmask 130048  }
   0xd   : > { %s327_s14 = scalar_lea.vmem %s3579_s0, %s2267_s11  ;;  %2782 = vset.pattern.permute.xlu1 %v2842_v3  ;;  %2466 = vmatprep.subr.mxu1 %v2931_v4  ;;  %v2954_v8 = vld [vmem:[%s3587_s8 + $0x68] sm:$0xff]  ;;  %v418_v10 = vld [vmem:[%s3581_s2 + $0x18] sm:$0xff]  ;;  %v2967_v11 = vld [vmem:[%s3587_s8 + $0x60] sm:$0xff]  ;;  %v334_v24 = vand.u32 127, %v333_v23  ;;  %vm2009_vm7 = vcmask 392192   ;;  %s2268_s20 = sshll.u32 %s3590_s10, 5 }
   0xe   : > { %v2908_v0 = vld [vmem:[%s327_s14 + $0x8] sm:$0xff]  ;;  %v2914_v1 = vld [vmem:[%s327_s14] sm:$0xff]  ;;  %2467 = vmatpush3.msra.mxu1 %v2931_v4  ;;  %v2973_v12 = vld [vmem:[%s3587_s8 + $0x58] sm:$0xff]  ;;  %s332_s24 = scalar_lea.vmem %s3588_s9, %s2268_s20 }
   0xf   : > { %406 = vrot.lane.b32.xlu0 %v2908_v0, %s2839_s15  ;;  %395 = vrot.lane.b32.xlu1 %v2908_v0, %s2840_s16  ;;  %v419_v13 = vld [vmem:[%s3581_s2 + $0x20] sm:$0xff]  ;;  %v420_v14 = vld [vmem:[%s3581_s2 + $0x28] sm:$0xff]  ;;  %v3041_v25 = vand.u32 15, %v334_v24 }
  0x10   : > { %2468 = vmatprep.subr.mxu1 %v2940_v5  ;;  %v2987_v15 = vld [vmem:[%s3587_s8 + $0x50] sm:$0xff]  ;;  %v2993_v16 = vld [vmem:[%s3587_s8 + $0x48] sm:$0xff]  ;;  %v3000_v17 = vld [vmem:[%s3587_s8 + $0x40] sm:$0xff] }
  0x11   : > { %2469 = vmatpush3.msra.mxu1 %v2940_v5  ;;  %v3007_v18 = vld [vmem:[%s3587_s8 + $0x38] sm:$0xff]  ;;  %v3014_v19 = vld [vmem:[%s3587_s8 + $0x30] sm:$0xff]  ;;  %v3021_v20 = vld [vmem:[%s3587_s8 + $0x28] sm:$0xff]  ;;  %vm410_vm1 = vcmp.lt.s32.totalorder %v3041_v25, 14  ;;  %vm399_vm2 = vcmp.lt.s32.totalorder %v3041_v25, 15  ;;  %vm388_vm3 = vcmp.ge.s32.totalorder %v3041_v25, 1 }
  0x12   : > { %2470 = vmatprep.subr.mxu1 %v2954_v8  ;;  %v3028_v21 = vld [vmem:[%s3587_s8 + $0x20] sm:$0xff]  ;;  %v3035_v22 = vld [vmem:[%s3587_s8 + $0x18] sm:$0xff]  ;;  %vm377_vm4 = vcmp.ge.s32.totalorder %v3041_v25, 2  ;;  %v422_v34 = vld [vmem:[%s3580_s1 + $0x8] sm:$0xff] }
  0x13   : > { %404 = vrot.lane.b32.xlu0 %v2914_v1, %s2839_s15  ;;  %393 = vrot.lane.b32.xlu1 %v2914_v1, %s2840_s16  ;;  %v3090_v35 = vld [vmem:[%s3587_s8 + $0x10] sm:$0xff]  ;;  %v3097_v36 = vld [vmem:[%s3587_s8 + $0x8] sm:$0xff] }
  0x14   : > { %2471 = vmatpush3.msra.mxu1 %v2954_v8  ;;  %v3104_v37 = vld [vmem:[%s3587_s8] sm:$0xff]  ;;  %v3161_v51 = vld [vmem:[%s3586_s7 + $0x8] sm:$0xff]  ;;  %v3166_v52 = vld [vmem:[%s3586_s7 + $0x10] sm:$0xff] }
  0x15   : > { %2472 = vmatprep.subr.mxu1 %v2967_v11  ;;  %v3154_v46 = vld [vmem:[%s3586_s7] sm:$0xff]  ;;  %v3175_v53 = vld [vmem:[%s3586_s7 + $0x18] sm:$0xff] }
  0x16   : > { %2473 = vmatpush3.msra.mxu1 %v2967_v11 }
  0x17   : > { %384 = vrot.lane.b32.xlu0 %v2908_v0, %s2841_s19  ;;  %382 = vrot.lane.b32.xlu1 %v2914_v1, %s2841_s19 }
  0x18   : > { %2474 = vmatprep.subr.mxu1 %v2973_v12 }
  0x19   : > { %2475 = vmatpush3.msra.mxu1 %v2973_v12 }
  0x1a   : > { %2476 = vmatprep.subr.mxu1 %v2987_v15 }
  0x1b   : > { %373 = vrot.lane.b32.xlu0 %v2908_v0, %s2843_s22  ;;  %371 = vrot.lane.b32.xlu1 %v2914_v1, %s2843_s22 }
  0x1c   : > { %2477 = vmatpush3.msra.mxu1 %v2987_v15 }
  0x1d   : > { %2478 = vmatprep.subr.mxu1 %v2993_v16 }
  0x1e   : > { %2479 = vmatpush3.msra.mxu1 %v2993_v16 }
  0x1f   : > { %425 = vperm.xlu0 %2781, %v415_v6   ;;  %430 = vperm.xlu1 %2782, %v416_v7  }
  0x20   : > { %2480 = vmatprep.subr.mxu1 %v3000_v17 }
  0x21   : > { %2481 = vmatpush3.msra.mxu1 %v3000_v17 }
  0x22   : > { %2482 = vmatprep.subr.mxu1 %v3007_v18 }
  0x23   : > { %720 = vperm.xlu0 %2781, %v417_v9   ;;  %725 = vperm.xlu1 %2782, %v418_v10  }
  0x24   : > { %2483 = vmatpush3.msra.mxu1 %v3007_v18 }
  0x25   : > { %2484 = vmatprep.subr.mxu1 %v3014_v19 }
  0x26   : > { %2485 = vmatpush3.msra.mxu1 %v3014_v19 }
  0x27   : > { %732 = vperm.xlu0 %2781, %v419_v13   ;;  %737 = vperm.xlu1 %2782, %v420_v14  }
  0x28   : > { %2486 = vmatprep.subr.mxu1 %v3021_v20 }
  0x29   : > { %2487 = vmatpush3.msra.mxu1 %v3021_v20 }
  0x2a   : > { %2488 = vmatprep.subr.mxu1 %v3028_v21 }
  0x2b   : > { %2489 = vmatpush3.msra.mxu1 %v3028_v21 }
  0x2c   : > { %2490 = vmatprep.subr.mxu1 %v3035_v22 }
  0x2d   : > { %2491 = vmatpush3.msra.mxu1 %v3035_v22 }
  0x2e   : > { %2492 = vmatprep.subr.mxu1 %v3090_v35 }
  0x2f   : > { %2493 = vmatpush3.msra.mxu1 %v3090_v35 }
  0x30   : > { %2494 = vmatprep.subr.mxu1 %v3097_v36 }
  0x31   : > { %2495 = vmatpush3.msra.mxu1 %v3097_v36 }
  0x32   : > { %2496 = vmatprep.subr.mxu1 %v3104_v37 }
  0x33   : > { %2497 = vmatpush3.msra.mxu1 %v3104_v37 }
  0x34   : > { %2541 = vmatprep.subr.mxu1 %v2931_v4 }
  0x81   : > { %v407_v26 = vpop.permute.xlu0 %406  ;;  %v396_v27 = vpop.permute.xlu1 %395 }
  0x82   : > { %2443 = vmatprep.subr.msk.mxu0 %vm410_vm1, %v407_v26 }
  0x83   : > { %2444 = vmatpush3.msk.msra.mxu0 %vm410_vm1, %v407_v26 }
  0x85   : > { %v405_v28 = vpop.permute.xlu0 %404  ;;  %v394_v29 = vpop.permute.xlu1 %393 }
  0x86   : > { %2445 = vmatprep.subr.msk.mxu0 %vm410_vm1, %v405_v28 }
  0x87   : > { %2446 = vmatpush3.msk.msra.mxu0 %vm410_vm1, %v405_v28 }
  0x88   : > { %2447 = vmatprep.subr.msk.mxu0 %vm399_vm2, %v396_v27 }
  0x89   : > { %2448 = vmatpush3.msk.msra.mxu0 %vm399_vm2, %v396_v27  ;;  %v385_v30 = vpop.permute.xlu0 %384  ;;  %v383_v31 = vpop.permute.xlu1 %382 }
  0x8a   : > { %2449 = vmatprep.subr.msk.mxu0 %vm399_vm2, %v394_v29 }
  0x8b   : > { %2450 = vmatpush3.msk.msra.mxu0 %vm399_vm2, %v394_v29 }
  0x8c   : > { %2451 = vmatprep.subr.mxu0 %v2908_v0 }
  0x8d   : > { %2452 = vmatpush3.msra.mxu0 %v2908_v0  ;;  %v374_v32 = vpop.permute.xlu0 %373  ;;  %v372_v33 = vpop.permute.xlu1 %371 }
  0x8e   : > { %2453 = vmatprep.subr.mxu0 %v2914_v1 }
  0x8f   : > { %2454 = vmatpush3.msra.mxu0 %v2914_v1 }
  0x90   : > { %2455 = vmatprep.subr.msk.mxu0 %vm388_vm3, %v385_v30 }
  0x91   : > { %2456 = vmatpush3.msk.msra.mxu0 %vm388_vm3, %v385_v30 }
  0x92   : > { %2457 = vmatprep.subr.msk.mxu0 %vm388_vm3, %v383_v31 }
  0x93   : > { %2458 = vmatpush3.msk.msra.mxu0 %vm388_vm3, %v383_v31 }
  0x94   : > { %2459 = vmatprep.subr.msk.mxu0 %vm377_vm4, %v374_v32 }
  0x95   : > { %2460 = vmatpush3.msk.msra.mxu0 %vm377_vm4, %v374_v32 }
  0x96   : > { %2461 = vmatprep.subr.msk.mxu0 %vm377_vm4, %v372_v33 }
  0x97   : > { %2462 = vmatpush3.msk.msra.mxu0 %vm377_vm4, %v372_v33 }
  0x98   : > { %2464 = vmatmul.mubr.msk.f32.vlgmr.msra.gmra.mxu0 %vm433_vm0, %v422_v34 }
  0x99   : > { %2512 = vmatprep.mubr.msk.f32.mxu0 %vm602_vm5, %v3154_v46 }
  0x9a   : > { %v426_v39 = vpop.permute.xlu0 %425  ;;  %v431_v41 = vpop.permute.xlu1 %430 }
  0x9e   : > { %v726_v13 = vpop.permute.xlu1 %725  ;;  %v721_v24 = vpop.permute.xlu0 %720 }
  0xa2   : > { %v738_v31 = vpop.permute.xlu1 %737  ;;  %v733_v34 = vpop.permute.xlu0 %732 }
 0x158   : > { %v2465_v38 = vpop.f32.mrf.mxu0 }
 0x159   : > { %v3111_v43 = vadd.f32 %v2465_v38, %v431_v41 }
 0x15a   : > { %v506_v40 = vpop.f32.mrf.mxu0 }
 0x15b   : > { %v3109_v42 = vadd.f32 %v506_v40, %v426_v39  ;;  %v516_v45 = vmul.f32 %v3111_v43, %v3111_v43 }
 0x15d   : > { %2498 = vmatprep.mubr.f32.mxu1 %v3109_v42  ;;  %v515_v44 = vmul.f32 %v3109_v42, %v3109_v42 }
 0x15e   : > { %2499 = vmatmul.mubr.f32.vlgmr.msra.gmra.mxu1 %v3111_v43 }
 0x15f   : > { %2501 = vmatprep.mubr.f32.mxu1 %v515_v44  ;;  %2542 = vmatpush3.msra.mxu1 %v2931_v4 }
 0x160   : > { %2543 = vmatprep.subr.mxu1 %v2940_v5 }
 0x161   : > { %2544 = vmatpush3.msra.mxu1 %v2940_v5 }
 0x162   : > { %2502 = vmatmul.mubr.f32.gmra.mxu1 %v516_v45  ;;  %2545 = vmatprep.subr.mxu1 %v2954_v8 }
 0x163   : > { %2546 = vmatpush3.msra.mxu1 %v2954_v8 }
 0x164   : > { %2547 = vmatprep.subr.mxu1 %v2967_v11 }
 0x165   : > { %2548 = vmatpush3.msra.mxu1 %v2967_v11 }
 0x166   : > { %2549 = vmatprep.subr.mxu1 %v2973_v12 }
 0x167   : > { %2550 = vmatpush3.msra.mxu1 %v2973_v12 }
 0x168   : > { %2551 = vmatprep.subr.mxu1 %v2987_v15 }
 0x169   : > { %2552 = vmatpush3.msra.mxu1 %v2987_v15 }
 0x16a   : > { %2553 = vmatprep.subr.mxu1 %v2993_v16 }
 0x16b   : > { %2554 = vmatpush3.msra.mxu1 %v2993_v16 }
 0x16c   : > { %2555 = vmatprep.subr.mxu1 %v3000_v17 }
 0x16d   : > { %2556 = vmatpush3.msra.mxu1 %v3000_v17 }
 0x16e   : > { %2557 = vmatprep.subr.mxu1 %v3007_v18 }
 0x16f   : > { %2558 = vmatpush3.msra.mxu1 %v3007_v18 }
 0x170   : > { %2559 = vmatprep.subr.mxu1 %v3014_v19 }
 0x171   : > { %2560 = vmatpush3.msra.mxu1 %v3014_v19 }
 0x172   : > { %2561 = vmatprep.subr.mxu1 %v3021_v20 }
 0x173   : > { %2562 = vmatpush3.msra.mxu1 %v3021_v20 }
 0x174   : > { %2563 = vmatprep.subr.mxu1 %v3028_v21 }
 0x175   : > { %2564 = vmatpush3.msra.mxu1 %v3028_v21 }
 0x176   : > { %2565 = vmatprep.subr.mxu1 %v3035_v22 }
 0x177   : > { %2566 = vmatpush3.msra.mxu1 %v3035_v22 }
 0x178   : > { %2567 = vmatprep.subr.mxu1 %v3090_v35 }
 0x179   : > { %2568 = vmatpush3.msra.mxu1 %v3090_v35 }
 0x17a   : > { %2569 = vmatprep.subr.mxu1 %v3097_v36 }
 0x17b   : > { %2570 = vmatpush3.msra.mxu1 %v3097_v36 }
 0x17c   : > { %2571 = vmatprep.subr.mxu1 %v3104_v37 }
 0x17d   : > { %2572 = vmatpush3.msra.mxu1 %v3104_v37 }
 0x17e   : > { %2623 = vmatprep.subr.mxu1 %v2931_v4 }
 0x21e   : > { %v2500_v47 = vpop.f32.mrf.mxu1 }
 0x220   : > { %v583_v48 = vpop.f32.mrf.mxu1 }
 0x222   : > { %v2503_v49 = vpop.f32.mrf.mxu1 }
 0x223   : > { %2504 = vmatprep.subr.mxu0 %v2503_v49 }
 0x224   : > { %v593_v50 = vpop.f32.mrf.mxu1  ;;  %2505 = vmatpush3.msra.mxu0 %v2503_v49 }
 0x225   : > { %2506 = vmatprep.subr.mxu0 %v593_v50 }
 0x226   : > { %2507 = vmatpush3.msra.mxu0 %v593_v50 }
 0x227   : > { %2508 = vmatprep.subr.mxu0 %v2500_v47 }
 0x228   : > { %2509 = vmatpush3.msra.mxu0 %v2500_v47 }
 0x229   : > { %2510 = vmatprep.subr.mxu0 %v583_v48 }
 0x22a   : > { %2511 = vmatpush3.msra.mxu0 %v583_v48 }
 0x22b   : > { %2513 = vmatmul.mubr.msk.f32.vlgmr.msra.gmra.mxu0 %vm602_vm5, %v3161_v51 }
 0x22c   : > { %2515 = vmatprep.mubr.msk.f32.mxu0 %vm602_vm5, %v3166_v52 }
 0x22f   : > { %2516 = vmatmul.mubr.msk.f32.gmra.mxu0 %vm602_vm5, %v3175_v53 }
 0x2eb   : > { %v2514_v54 = vpop.f32.mrf.mxu0 }
 0x2ec   : > { %v701_v55 = vmul.f32 0.03125, %v2514_v54 }
 0x2ed   : > { %v681_v56 = vpop.f32.mrf.mxu0 }
 0x2ee   : > { %v700_v57 = vmul.f32 0.03125, %v681_v56  ;;  %v705_v59 = vmul.f32 %v701_v55, %v701_v55  ;;  %v711_v14 = vsub.f32 %v3111_v43, %v701_v55 }
 0x2ef   : > { %v2517_v58 = vpop.f32.mrf.mxu0 }
 0x2f0   : > { %v703_v60 = vmul.f32 0.03125, %v2517_v58  ;;  %v704_v62 = vmul.f32 %v700_v57, %v700_v57  ;;  %v710_v26 = vsub.f32 %v3109_v42, %v700_v57 }
 0x2f1   : > { %v691_v61 = vpop.f32.mrf.mxu0 }
 0x2f2   : > { %v707_v63 = vsub.f32 %v703_v60, %v705_v59  ;;  %v702_v2 = vmul.f32 0.03125, %v691_v61  ;;  %v2195_v61 = vld [vmem:[%s3580_s1 + $0x10] sm:$0xff] }
 0x2f3   : > { %2538 = vmatprep.mubr.msk.f32.mxu0 %vm433_vm0, %v2195_v61 }
 0x2f4   : > { %v709_v3 = vmax.f32 %v707_v63, 0.0  ;;  %v706_v6 = vsub.f32 %v702_v2, %v704_v62  ;;  %v2189_v62 = vld [vmem:[%s3581_s2 + $0x30] sm:$0xff]  ;;  %v2190_v63 = vld [vmem:[%s3581_s2 + $0x38] sm:$0xff]  ;;  %v2192_v2 = vld [vmem:[%s3581_s2 + $0x48] sm:$0xff] }
 0x2f6   : > { %v713_v7 = vadd.f32 1e-05, %v709_v3  ;;  %v708_v9 = vmax.f32 %v706_v6, 0.0  ;;  %v2191_v3 = vld [vmem:[%s3581_s2 + $0x40] sm:$0xff]  ;;  %v2194_v6 = vld [vmem:[%s3581_s2 + $0x58] sm:$0xff] }
 0x2f8   : > { %2783 = vrsqrt.f32 %v713_v7  ;;  %v712_v10 = vadd.f32 1e-05, %v708_v9  ;;  %v2193_v7 = vld [vmem:[%s3581_s2 + $0x50] sm:$0xff]  ;;  %v1214_v9 = vld [vmem:[%s3583_s4 + $0x8] sm:$0xff] }
 0x2fa   : > { %2785 = vrsqrt.f32 %v712_v10  ;;  %v1213_v10 = vld [vmem:[%s3583_s4] sm:$0xff] }
 0x305   : > { %v2784_v23 = vpop.eup %2783 }
 0x306   : > { %v717_v27 = vmul.f32 %v2784_v23, %v711_v14 }
 0x307   : > { %v2786_v28 = vpop.eup %2785 }
 0x308   : > { %v729_v29 = vmul.f32 %v726_v13, %v717_v27  ;;  %v716_v30 = vmul.f32 %v2786_v28, %v710_v26 }
 0x30a   : > { %v728_v32 = vmul.f32 %v721_v24, %v716_v30  ;;  %v741_v33 = vadd.f32 %v738_v31, %v729_v29  ;;  %v2196_v30 = vld [vmem:[%s3580_s1 + $0x18] sm:$0xff] }
 0x30c   : > { %v743_v38 = vmin.f32 %v741_v33, 20.0  ;;  %v740_v39 = vadd.f32 %v733_v34, %v728_v32 }
 0x30e   : > { %v746_v40 = vmul.f32 1.442695, %v743_v38  ;;  %v742_v41 = vmin.f32 %v740_v39, 20.0 }
 0x310   : > { %2787 = vpow2.f32 %v746_v40  ;;  %v744_v44 = vmul.f32 1.442695, %v742_v41 }
 0x312   : > { %2789 = vpow2.f32 %v744_v44 }
 0x31d   : > { %v2788_v43 = vpop.eup %2787 }
 0x31e   : > { %v749_v45 = vadd.f32 2.0, %v2788_v43 }
 0x31f   : > { %v2790_v47 = vpop.eup %2789 }
 0x320   : > { %v751_v48 = vmul.f32 %v2788_v43, %v749_v45  ;;  %v748_v42 = vadd.f32 2.0, %v2790_v47 }
 0x322   : > { %v753_v49 = vadd.f32 2.0, %v751_v48  ;;  %v750_v50 = vmul.f32 %v2790_v47, %v748_v42  ;;  %v1128_v42 = vld [vmem:[%s3582_s3 + $0x8] sm:$0xff] }
 0x324   : > { %2791 = vrcp.f32 %v753_v49  ;;  %v752_v54 = vadd.f32 2.0, %v750_v50 }
 0x326   : > { %2793 = vrcp.f32 %v752_v54 }
 0x331   : > { %v2792_v55 = vpop.eup %2791 }
 0x332   : > { %v757_v56 = vmul.f32 %v2792_v55, %v751_v48  ;;  %v1127_v48 = vld [vmem:[%s3582_s3] sm:$0xff] }
 0x333   : > { %v2794_v57 = vpop.eup %2793 }
 0x334   : > { %v759_v58 = vmul.f32 %v757_v56, %v741_v33  ;;  %v755_v59 = vmul.f32 %v2794_v57, %v750_v50 }
 0x336   : > { %788 = vrot.lane.b32.xlu1 %v759_v58, %s2839_s15  ;;  %v758_v60 = vmul.f32 %v755_v59, %v740_v39 }
 0x338   : > { %786 = vrot.lane.b32.xlu0 %v758_v60, %s2839_s15 }
 0x33a   : > { %780 = vrot.lane.b32.xlu1 %v759_v58, %s2840_s16 }
 0x33c   : > { %778 = vrot.lane.b32.xlu0 %v758_v60, %s2840_s16 }
 0x33e   : > { %772 = vrot.lane.b32.xlu1 %v759_v58, %s2841_s19 }
 0x340   : > { %770 = vrot.lane.b32.xlu0 %v758_v60, %s2841_s19 }
 0x342   : > { %764 = vrot.lane.b32.xlu1 %v759_v58, %s2843_s22 }
 0x344   : > { %762 = vrot.lane.b32.xlu0 %v758_v60, %s2843_s22 }
 0x346   : > { %806 = vperm.xlu1 %2782, %v2189_v62  }
 0x348   : > { %811 = vperm.xlu0 %2781, %v2190_v63  }
 0x34a   : > { %1092 = vperm.xlu1 %2782, %v2192_v2  }
 0x34c   : > { %1087 = vperm.xlu0 %2781, %v2191_v3  }
 0x34e   : > { %1104 = vperm.xlu1 %2782, %v2194_v6  }
 0x350   : > { %1099 = vperm.xlu0 %2781, %v2193_v7  }
 0x352   : > { %1222 = vperm.xlu1 %2782, %v1214_v9  }
 0x354   : > { %1217 = vperm.xlu0 %2781, %v1213_v10  }
 0x3a8   : > { %v789_v13 = vpop.permute.xlu1 %788 }
 0x3a9   : > { %2518 = vmatprep.subr.msk.mxu0 %vm410_vm1, %v789_v13 }
 0x3aa   : > { %2519 = vmatpush3.msk.msra.mxu0 %vm410_vm1, %v789_v13  ;;  %v787_v14 = vpop.permute.xlu0 %786 }
 0x3ab   : > { %2520 = vmatprep.subr.msk.mxu0 %vm410_vm1, %v787_v14 }
 0x3ac   : > { %v781_v23 = vpop.permute.xlu1 %780  ;;  %2521 = vmatpush3.msk.msra.mxu0 %vm410_vm1, %v787_v14 }
 0x3ad   : > { %2522 = vmatprep.subr.msk.mxu0 %vm399_vm2, %v781_v23 }
 0x3ae   : > { %2523 = vmatpush3.msk.msra.mxu0 %vm399_vm2, %v781_v23  ;;  %v779_v24 = vpop.permute.xlu0 %778 }
 0x3af   : > { %2524 = vmatprep.subr.msk.mxu0 %vm399_vm2, %v779_v24 }
 0x3b0   : > { %2525 = vmatpush3.msk.msra.mxu0 %vm399_vm2, %v779_v24  ;;  %v773_v26 = vpop.permute.xlu1 %772 }
 0x3b1   : > { %2526 = vmatprep.subr.mxu0 %v759_v58 }
 0x3b2   : > { %2527 = vmatpush3.msra.mxu0 %v759_v58  ;;  %v771_v27 = vpop.permute.xlu0 %770 }
 0x3b3   : > { %2528 = vmatprep.subr.mxu0 %v758_v60 }
 0x3b4   : > { %2529 = vmatpush3.msra.mxu0 %v758_v60  ;;  %v765_v28 = vpop.permute.xlu1 %764 }
 0x3b5   : > { %2530 = vmatprep.subr.msk.mxu0 %vm388_vm3, %v773_v26 }
 0x3b6   : > { %2531 = vmatpush3.msk.msra.mxu0 %vm388_vm3, %v773_v26  ;;  %v763_v29 = vpop.permute.xlu0 %762 }
 0x3b7   : > { %2532 = vmatprep.subr.msk.mxu0 %vm388_vm3, %v771_v27 }
 0x3b8   : > { %2533 = vmatpush3.msk.msra.mxu0 %vm388_vm3, %v771_v27 }
 0x3b9   : > { %2534 = vmatprep.subr.msk.mxu0 %vm377_vm4, %v765_v28 }
 0x3ba   : > { %2535 = vmatpush3.msk.msra.mxu0 %vm377_vm4, %v765_v28 }
 0x3bb   : > { %2536 = vmatprep.subr.msk.mxu0 %vm377_vm4, %v763_v29 }
 0x3bc   : > { %2537 = vmatpush3.msk.msra.mxu0 %vm377_vm4, %v763_v29 }
 0x3bd   : > { %2539 = vmatmul.mubr.msk.f32.vlgmr.msra.gmra.mxu0 %vm433_vm0, %v2196_v30 }
 0x3be   : > { %2587 = vmatprep.mubr.msk.f32.mxu0 %vm602_vm5, %v3154_v46 }
 0x3c1   : > { %v807_v32 = vpop.permute.xlu1 %806 }
 0x3c3   : > { %v812_v34 = vpop.permute.xlu0 %811 }
 0x3c5   : > { %v1093_v6 = vpop.permute.xlu1 %1092 }
 0x3c7   : > { %v1088_v10 = vpop.permute.xlu0 %1087 }
 0x3c9   : > { %v1105_v27 = vpop.permute.xlu1 %1104 }
 0x3cb   : > { %v1100_v30 = vpop.permute.xlu0 %1099 }
 0x47d   : > { %v2540_v31 = vpop.f32.mrf.mxu0 }
 0x47e   : > { %v3257_v39 = vadd.f32 %v2540_v31, %v812_v34 }
 0x47f   : > { %v886_v33 = vpop.f32.mrf.mxu0 }
 0x480   : > { %v3255_v38 = vadd.f32 %v886_v33, %v807_v32  ;;  %v896_v41 = vmul.f32 %v3257_v39, %v3257_v39 }
 0x482   : > { %2573 = vmatprep.mubr.f32.mxu1 %v3255_v38  ;;  %v895_v40 = vmul.f32 %v3255_v38, %v3255_v38 }
 0x483   : > { %2574 = vmatmul.mubr.f32.vlgmr.msra.gmra.mxu1 %v3257_v39 }
 0x484   : > { %2576 = vmatprep.mubr.f32.mxu1 %v895_v40  ;;  %2624 = vmatpush3.msra.mxu1 %v2931_v4 }
 0x485   : > { %2625 = vmatprep.subr.mxu1 %v2940_v5 }
 0x486   : > { %2626 = vmatpush3.msra.mxu1 %v2940_v5 }
 0x487   : > { %2577 = vmatmul.mubr.f32.gmra.mxu1 %v896_v41  ;;  %2627 = vmatprep.subr.mxu1 %v2954_v8 }
 0x488   : > { %2628 = vmatpush3.msra.mxu1 %v2954_v8 }
 0x489   : > { %2629 = vmatprep.subr.mxu1 %v2967_v11 }
 0x48a   : > { %2630 = vmatpush3.msra.mxu1 %v2967_v11 }
 0x48b   : > { %2631 = vmatprep.subr.mxu1 %v2973_v12 }
 0x48c   : > { %2632 = vmatpush3.msra.mxu1 %v2973_v12 }
 0x48d   : > { %2633 = vmatprep.subr.mxu1 %v2987_v15 }
 0x48e   : > { %2634 = vmatpush3.msra.mxu1 %v2987_v15 }
 0x48f   : > { %2635 = vmatprep.subr.mxu1 %v2993_v16 }
 0x490   : > { %2636 = vmatpush3.msra.mxu1 %v2993_v16 }
 0x491   : > { %2637 = vmatprep.subr.mxu1 %v3000_v17 }
 0x492   : > { %2638 = vmatpush3.msra.mxu1 %v3000_v17 }
 0x493   : > { %2639 = vmatprep.subr.mxu1 %v3007_v18 }
 0x494   : > { %2640 = vmatpush3.msra.mxu1 %v3007_v18 }
 0x495   : > { %2641 = vmatprep.subr.mxu1 %v3014_v19 }
 0x496   : > { %2642 = vmatpush3.msra.mxu1 %v3014_v19 }
 0x497   : > { %2643 = vmatprep.subr.mxu1 %v3021_v20 }
 0x498   : > { %2644 = vmatpush3.msra.mxu1 %v3021_v20 }
 0x499   : > { %2645 = vmatprep.subr.mxu1 %v3028_v21 }
 0x49a   : > { %2646 = vmatpush3.msra.mxu1 %v3028_v21 }
 0x49b   : > { %2647 = vmatprep.subr.mxu1 %v3035_v22 }
 0x49c   : > { %2648 = vmatpush3.msra.mxu1 %v3035_v22 }
 0x49d   : > { %2649 = vmatprep.subr.mxu1 %v3090_v35 }
 0x49e   : > { %2650 = vmatpush3.msra.mxu1 %v3090_v35 }
 0x49f   : > { %2651 = vmatprep.subr.mxu1 %v3097_v36 }
 0x4a0   : > { %2652 = vmatpush3.msra.mxu1 %v3097_v36 }
 0x4a1   : > { %2653 = vmatprep.subr.mxu1 %v3104_v37 }
 0x4a2   : > { %2654 = vmatpush3.msra.mxu1 %v3104_v37 }
 0x4a3   : > { %2698 = vmatprep.subr.mxu1 %v2931_v4 }
 0x543   : > { %v2575_v44 = vpop.f32.mrf.mxu1 }
 0x545   : > { %v963_v43 = vpop.f32.mrf.mxu1 }
 0x547   : > { %v2578_v45 = vpop.f32.mrf.mxu1 }
 0x548   : > { %2579 = vmatprep.subr.mxu0 %v2578_v45 }
 0x549   : > { %v973_v47 = vpop.f32.mrf.mxu1  ;;  %2580 = vmatpush3.msra.mxu0 %v2578_v45 }
 0x54a   : > { %2581 = vmatprep.subr.mxu0 %v973_v47 }
 0x54b   : > { %2582 = vmatpush3.msra.mxu0 %v973_v47 }
 0x54c   : > { %2583 = vmatprep.subr.mxu0 %v2575_v44 }
 0x54d   : > { %2584 = vmatpush3.msra.mxu0 %v2575_v44 }
 0x54e   : > { %2585 = vmatprep.subr.mxu0 %v963_v43 }
 0x54f   : > { %2586 = vmatpush3.msra.mxu0 %v963_v43 }
 0x550   : > { %2588 = vmatmul.mubr.msk.f32.vlgmr.msra.gmra.mxu0 %vm602_vm5, %v3161_v51  ;;  %2593 = vmatprep.subr.mxu0 %v2908_v0 }
 0x551   : > { %2590 = vmatprep.mubr.msk.f32.mxu0 %vm602_vm5, %v3166_v52  ;;  %2594 = vmatpush3.msra.mxu0 %v2908_v0 }
 0x552   : > { %2595 = vmatprep.subr.mxu0 %v2914_v1 }
 0x553   : > { %2596 = vmatpush3.msra.mxu0 %v2914_v1 }
 0x554   : > { %2591 = vmatmul.mubr.msk.f32.gmra.mxu0 %vm602_vm5, %v3175_v53 }
 0x555   : > { %2597 = vmatprep.mubr.msk.f32.mxu0 %vm1129_vm6, %v1127_v48 }
 0x558   : > { %2598 = vmatmul.mubr.msk.f32.vlgmr.msra.gmra.mxu0 %vm1129_vm6, %v1128_v42 }
 0x610   : > { %v2589_v49 = vpop.f32.mrf.mxu0 }
 0x611   : > { %v1068_v0 = vmul.f32 0.03125, %v2589_v49 }
 0x612   : > { %v1048_v50 = vpop.f32.mrf.mxu0 }
 0x613   : > { %v1067_v54 = vmul.f32 0.03125, %v1048_v50  ;;  %v1072_v56 = vmul.f32 %v1068_v0, %v1068_v0  ;;  %v1078_v7 = vsub.f32 %v3257_v39, %v1068_v0 }
 0x614   : > { %v2592_v55 = vpop.f32.mrf.mxu0 }
 0x615   : > { %v1070_v57 = vmul.f32 0.03125, %v2592_v55  ;;  %v1071_v59 = vmul.f32 %v1067_v54, %v1067_v54  ;;  %v1077_v13 = vsub.f32 %v3255_v38, %v1067_v54 }
 0x616   : > { %v1058_v58 = vpop.f32.mrf.mxu0 }
 0x617   : > { %v1074_v60 = vsub.f32 %v1070_v57, %v1072_v56  ;;  %v1069_v1 = vmul.f32 0.03125, %v1058_v58  ;;  %v1223_v58 = vpop.permute.xlu1 %1222 }
 0x618   : > { %v2599_v50 = vpop.f32.mrf.mxu0 }
 0x619   : > { %v1076_v61 = vmax.f32 %v1074_v60, 0.0  ;;  %v1073_v62 = vsub.f32 %v1069_v1, %v1071_v59 }
 0x61a   : > { %v1202_v59 = vpop.f32.mrf.mxu0 }
 0x61b   : > { %v1080_v63 = vadd.f32 1e-05, %v1076_v61  ;;  %v1075_v2 = vmax.f32 %v1073_v62, 0.0  ;;  %v1218_v61 = vpop.permute.xlu0 %1217 }
 0x61d   : > { %2795 = vrsqrt.f32 %v1080_v63  ;;  %v1079_v3 = vadd.f32 1e-05, %v1075_v2  ;;  %v2219_v63 = vld [vmem:[%s3580_s1 + $0x20] sm:$0xff] }
 0x61e   : > { %2620 = vmatprep.mubr.msk.f32.mxu0 %vm433_vm0, %v2219_v63  ;;  %v2213_v2 = vld [vmem:[%s3581_s2 + $0x60] sm:$0xff] }
 0x61f   : > { %2797 = vrsqrt.f32 %v1079_v3  ;;  %v2214_v3 = vld [vmem:[%s3581_s2 + $0x68] sm:$0xff] }
 0x62a   : > { %v2796_v9 = vpop.eup %2795 }
 0x62b   : > { %v1084_v14 = vmul.f32 %v2796_v9, %v1078_v7  ;;  %v2215_v7 = vld [vmem:[%s3581_s2 + $0x70] sm:$0xff]  ;;  %v2218_v9 = vld [vmem:[%s3581_s2 + $0x88] sm:$0xff] }
 0x62c   : > { %v2798_v23 = vpop.eup %2797 }
 0x62d   : > { %v1096_v24 = vmul.f32 %v1093_v6, %v1084_v14  ;;  %v1083_v26 = vmul.f32 %v2798_v23, %v1077_v13  ;;  %v2216_v6 = vld [vmem:[%s3581_s2 + $0x78] sm:$0xff] }
 0x62f   : > { %v1108_v28 = vadd.f32 %v1105_v27, %v1096_v24  ;;  %v1095_v29 = vmul.f32 %v1088_v10, %v1083_v26  ;;  %v2217_v10 = vld [vmem:[%s3581_s2 + $0x80] sm:$0xff] }
 0x631   : > { %v1110_v31 = vmin.f32 %v1108_v28, 20.0  ;;  %v1107_v32 = vadd.f32 %v1100_v30, %v1095_v29  ;;  %v2220_v30 = vld [vmem:[%s3580_s1 + $0x28] sm:$0xff] }
 0x633   : > { %v1113_v33 = vmul.f32 1.442695, %v1110_v31  ;;  %v1109_v34 = vmin.f32 %v1107_v32, 20.0 }
 0x635   : > { %2799 = vpow2.f32 %v1113_v33  ;;  %v1111_v40 = vmul.f32 1.442695, %v1109_v34 }
 0x637   : > { %2801 = vpow2.f32 %v1111_v40 }
 0x642   : > { %v2800_v39 = vpop.eup %2799 }
 0x643   : > { %v1116_v41 = vadd.f32 2.0, %v2800_v39 }
 0x644   : > { %v2802_v44 = vpop.eup %2801 }
 0x645   : > { %v1118_v43 = vmul.f32 %v2800_v39, %v1116_v41  ;;  %v1115_v38 = vadd.f32 2.0, %v2802_v44 }
 0x647   : > { %v1120_v45 = vadd.f32 2.0, %v1118_v43  ;;  %v1117_v47 = vmul.f32 %v2802_v44, %v1115_v38 }
 0x649   : > { %2803 = vrcp.f32 %v1120_v45  ;;  %v1119_v48 = vadd.f32 2.0, %v1117_v47 }
 0x64b   : > { %2805 = vrcp.f32 %v1119_v48 }
 0x656   : > { %v2804_v42 = vpop.eup %2803 }
 0x657   : > { %v1124_v49 = vmul.f32 %v2804_v42, %v1118_v43 }
 0x658   : > { %v2806_v0 = vpop.eup %2805 }
 0x659   : > { %v1126_v54 = vmul.f32 %v1124_v49, %v1108_v28  ;;  %v1122_v55 = vmul.f32 %v2806_v0, %v1117_v47 }
 0x65b   : > { %v1212_v56 = vadd.f32 %v2599_v50, %v1126_v54  ;;  %v1125_v57 = vmul.f32 %v1122_v55, %v1107_v32 }
 0x65d   : > { %v3315_v60 = vadd.f32 %v1223_v58, %v1212_v56  ;;  %v1211_v1 = vadd.f32 %v1202_v59, %v1125_v57 }
 0x65f   : > { %v3317_v62 = vadd.f32 %v1218_v61, %v1211_v1  ;;  %1255 = vrot.lane.b32.xlu1 %v3315_v60, %s2839_s15 }
 0x661   : > { %1253 = vrot.lane.b32.xlu0 %v3317_v62, %s2839_s15 }
 0x663   : > { %1247 = vrot.lane.b32.xlu1 %v3315_v60, %s2840_s16 }
 0x665   : > { %1245 = vrot.lane.b32.xlu0 %v3317_v62, %s2840_s16 }
 0x667   : > { %1239 = vrot.lane.b32.xlu1 %v3315_v60, %s2841_s19 }
 0x669   : > { %1237 = vrot.lane.b32.xlu0 %v3317_v62, %s2841_s19 }
 0x66b   : > { %1231 = vrot.lane.b32.xlu1 %v3315_v60, %s2843_s22 }
 0x66d   : > { %1229 = vrot.lane.b32.xlu0 %v3317_v62, %s2843_s22 }
 0x66f   : > { %1273 = vperm.xlu1 %2782, %v2213_v2  }
 0x671   : > { %1278 = vperm.xlu0 %2781, %v2214_v3  }
 0x673   : > { %1559 = vperm.xlu1 %2782, %v2216_v6  }
 0x675   : > { %1554 = vperm.xlu0 %2781, %v2215_v7  }
 0x677   : > { %1571 = vperm.xlu1 %2782, %v2218_v9  }
 0x679   : > { %1566 = vperm.xlu0 %2781, %v2217_v10  }
 0x6d1   : > { %v1256_v13 = vpop.permute.xlu1 %1255 }
 0x6d2   : > { %2600 = vmatprep.subr.msk.mxu0 %vm410_vm1, %v1256_v13 }
 0x6d3   : > { %2601 = vmatpush3.msk.msra.mxu0 %vm410_vm1, %v1256_v13  ;;  %v1254_v14 = vpop.permute.xlu0 %1253 }
 0x6d4   : > { %2602 = vmatprep.subr.msk.mxu0 %vm410_vm1, %v1254_v14 }
 0x6d5   : > { %v1248_v23 = vpop.permute.xlu1 %1247  ;;  %2603 = vmatpush3.msk.msra.mxu0 %vm410_vm1, %v1254_v14 }
 0x6d6   : > { %2604 = vmatprep.subr.msk.mxu0 %vm399_vm2, %v1248_v23 }
 0x6d7   : > { %2605 = vmatpush3.msk.msra.mxu0 %vm399_vm2, %v1248_v23  ;;  %v1246_v24 = vpop.permute.xlu0 %1245 }
 0x6d8   : > { %2606 = vmatprep.subr.msk.mxu0 %vm399_vm2, %v1246_v24 }
 0x6d9   : > { %2607 = vmatpush3.msk.msra.mxu0 %vm399_vm2, %v1246_v24  ;;  %v1240_v26 = vpop.permute.xlu1 %1239 }
 0x6da   : > { %2608 = vmatprep.subr.mxu0 %v3315_v60 }
 0x6db   : > { %2609 = vmatpush3.msra.mxu0 %v3315_v60  ;;  %v1238_v27 = vpop.permute.xlu0 %1237 }
 0x6dc   : > { %2610 = vmatprep.subr.mxu0 %v3317_v62 }
 0x6dd   : > { %2611 = vmatpush3.msra.mxu0 %v3317_v62  ;;  %v1232_v28 = vpop.permute.xlu1 %1231 }
 0x6de   : > { %2612 = vmatprep.subr.msk.mxu0 %vm388_vm3, %v1240_v26 }
 0x6df   : > { %2613 = vmatpush3.msk.msra.mxu0 %vm388_vm3, %v1240_v26  ;;  %v1230_v29 = vpop.permute.xlu0 %1229 }
 0x6e0   : > { %2614 = vmatprep.subr.msk.mxu0 %vm388_vm3, %v1238_v27 }
 0x6e1   : > { %2615 = vmatpush3.msk.msra.mxu0 %vm388_vm3, %v1238_v27 }
 0x6e2   : > { %2616 = vmatprep.subr.msk.mxu0 %vm377_vm4, %v1232_v28 }
 0x6e3   : > { %2617 = vmatpush3.msk.msra.mxu0 %vm377_vm4, %v1232_v28 }
 0x6e4   : > { %2618 = vmatprep.subr.msk.mxu0 %vm377_vm4, %v1230_v29 }
 0x6e5   : > { %2619 = vmatpush3.msk.msra.mxu0 %vm377_vm4, %v1230_v29 }
 0x6e6   : > { %2621 = vmatmul.mubr.msk.f32.vlgmr.msra.gmra.mxu0 %vm433_vm0, %v2220_v30 }
 0x6e7   : > { %2669 = vmatprep.mubr.msk.f32.mxu0 %vm602_vm5, %v3154_v46 }
 0x6ea   : > { %v1274_v32 = vpop.permute.xlu1 %1273 }
 0x6ec   : > { %v1279_v34 = vpop.permute.xlu0 %1278 }
 0x6ee   : > { %v1560_v48 = vpop.permute.xlu1 %1559 }
 0x6f0   : > { %v1555_v0 = vpop.permute.xlu0 %1554 }
 0x6f2   : > { %v1572_v58 = vpop.permute.xlu1 %1571 }
 0x6f4   : > { %v1567_v61 = vpop.permute.xlu0 %1566 }
 0x7a6   : > { %v2622_v31 = vpop.f32.mrf.mxu0 }
 0x7a7   : > { %v3401_v39 = vadd.f32 %v2622_v31, %v1279_v34  ;;  %v2241_v34 = vld [vmem:[%s3580_s1 + $0x30] sm:$0xff] }
 0x7a8   : > { %v1353_v33 = vpop.f32.mrf.mxu0 }
 0x7a9   : > { %v3399_v40 = vadd.f32 %v1353_v33, %v1274_v32  ;;  %v1363_v44 = vmul.f32 %v3401_v39, %v3401_v39 }
 0x7ab   : > { %2655 = vmatprep.mubr.f32.mxu1 %v3399_v40  ;;  %v1362_v41 = vmul.f32 %v3399_v40, %v3399_v40 }
 0x7ac   : > { %2656 = vmatmul.mubr.f32.vlgmr.msra.gmra.mxu1 %v3401_v39 }
 0x7ad   : > { %2658 = vmatprep.mubr.f32.mxu1 %v1362_v41  ;;  %2699 = vmatpush3.msra.mxu1 %v2931_v4  ;;  %v2238_v41 = vld [vmem:[%s3581_s2 + $0xa8] sm:$0xff] }
 0x7ae   : > { %2700 = vmatprep.subr.mxu1 %v2940_v5 }
 0x7af   : > { %2701 = vmatpush3.msra.mxu1 %v2940_v5 }
 0x7b0   : > { %2659 = vmatmul.mubr.f32.gmra.mxu1 %v1363_v44  ;;  %2702 = vmatprep.subr.mxu1 %v2954_v8  ;;  %v2237_v44 = vld [vmem:[%s3581_s2 + $0xa0] sm:$0xff] }
 0x7b1   : > { %2703 = vmatpush3.msra.mxu1 %v2954_v8 }
 0x7b2   : > { %2704 = vmatprep.subr.mxu1 %v2967_v11 }
 0x7b3   : > { %2705 = vmatpush3.msra.mxu1 %v2967_v11 }
 0x7b4   : > { %2706 = vmatprep.subr.mxu1 %v2973_v12 }
 0x7b5   : > { %2707 = vmatpush3.msra.mxu1 %v2973_v12 }
 0x7b6   : > { %2708 = vmatprep.subr.mxu1 %v2987_v15 }
 0x7b7   : > { %2709 = vmatpush3.msra.mxu1 %v2987_v15 }
 0x7b8   : > { %2710 = vmatprep.subr.mxu1 %v2993_v16 }
 0x7b9   : > { %2711 = vmatpush3.msra.mxu1 %v2993_v16 }
 0x7ba   : > { %2712 = vmatprep.subr.mxu1 %v3000_v17 }
 0x7bb   : > { %2713 = vmatpush3.msra.mxu1 %v3000_v17 }
 0x7bc   : > { %2714 = vmatprep.subr.mxu1 %v3007_v18 }
 0x7bd   : > { %2715 = vmatpush3.msra.mxu1 %v3007_v18 }
 0x7be   : > { %2716 = vmatprep.subr.mxu1 %v3014_v19 }
 0x7bf   : > { %2717 = vmatpush3.msra.mxu1 %v3014_v19 }
 0x7c0   : > { %2718 = vmatprep.subr.mxu1 %v3021_v20 }
 0x7c1   : > { %2719 = vmatpush3.msra.mxu1 %v3021_v20 }
 0x7c2   : > { %2720 = vmatprep.subr.mxu1 %v3028_v21 }
 0x7c3   : > { %2721 = vmatpush3.msra.mxu1 %v3028_v21 }
 0x7c4   : > { %2722 = vmatprep.subr.mxu1 %v3035_v22 }
 0x7c5   : > { %2723 = vmatpush3.msra.mxu1 %v3035_v22 }
 0x7c6   : > { %2724 = vmatprep.subr.mxu1 %v3090_v35 }
 0x7c7   : > { %2725 = vmatpush3.msra.mxu1 %v3090_v35 }
 0x7c8   : > { %2726 = vmatprep.subr.mxu1 %v3097_v36 }
 0x7c9   : > { %2727 = vmatpush3.msra.mxu1 %v3097_v36 }
 0x7ca   : > { %2728 = vmatprep.subr.mxu1 %v3104_v37 }
 0x7cb   : > { %2729 = vmatpush3.msra.mxu1 %v3104_v37 }
 0x86c   : > { %v2657_v4 = vpop.f32.mrf.mxu1 }
 0x86e   : > { %v1430_v5 = vpop.f32.mrf.mxu1 }
 0x870   : > { %v2660_v8 = vpop.f32.mrf.mxu1 }
 0x871   : > { %2661 = vmatprep.subr.mxu0 %v2660_v8 }
 0x872   : > { %v1440_v11 = vpop.f32.mrf.mxu1  ;;  %2662 = vmatpush3.msra.mxu0 %v2660_v8 }
 0x873   : > { %2663 = vmatprep.subr.mxu0 %v1440_v11 }
 0x874   : > { %2664 = vmatpush3.msra.mxu0 %v1440_v11 }
 0x875   : > { %2665 = vmatprep.subr.mxu0 %v2657_v4 }
 0x876   : > { %2666 = vmatpush3.msra.mxu0 %v2657_v4  ;;  %v2240_v4 = vld [vmem:[%s3581_s2 + $0xb8] sm:$0xff] }
 0x877   : > { %2667 = vmatprep.subr.mxu0 %v1430_v5 }
 0x878   : > { %2668 = vmatpush3.msra.mxu0 %v1430_v5  ;;  %v2239_v5 = vld [vmem:[%s3581_s2 + $0xb0] sm:$0xff] }
 0x879   : > { %2670 = vmatmul.mubr.msk.f32.vlgmr.msra.gmra.mxu0 %vm602_vm5, %v3161_v51 }
 0x87a   : > { %2672 = vmatprep.mubr.msk.f32.mxu0 %vm602_vm5, %v3166_v52 }
 0x87d   : > { %2673 = vmatmul.mubr.msk.f32.gmra.mxu0 %vm602_vm5, %v3175_v53 }
 0x87e   : > { %2695 = vmatprep.mubr.msk.f32.mxu0 %vm433_vm0, %v2241_v34 }
 0x939   : > { %v2671_v12 = vpop.f32.mrf.mxu0 }
 0x93a   : > { %v1535_v15 = vmul.f32 0.03125, %v2671_v12 }
 0x93b   : > { %v1515_v16 = vpop.f32.mrf.mxu0 }
 0x93c   : > { %v1534_v17 = vmul.f32 0.03125, %v1515_v16  ;;  %v1539_v19 = vmul.f32 %v1535_v15, %v1535_v15  ;;  %v1545_v42 = vsub.f32 %v3401_v39, %v1535_v15  ;;  %v2236_v39 = vld [vmem:[%s3581_s2 + $0x98] sm:$0xff] }
 0x93d   : > { %v2674_v18 = vpop.f32.mrf.mxu0 }
 0x93e   : > { %v1537_v20 = vmul.f32 0.03125, %v2674_v18  ;;  %v1538_v22 = vmul.f32 %v1534_v17, %v1534_v17  ;;  %v1544_v50 = vsub.f32 %v3399_v40, %v1534_v17  ;;  %v2235_v40 = vld [vmem:[%s3581_s2 + $0x90] sm:$0xff] }
 0x93f   : > { %v1525_v21 = vpop.f32.mrf.mxu0 }
 0x940   : > { %v1541_v35 = vsub.f32 %v1537_v20, %v1539_v19  ;;  %v1536_v36 = vmul.f32 0.03125, %v1525_v21  ;;  %v2242_v20 = vld [vmem:[%s3580_s1 + $0x38] sm:$0xff] }
 0x942   : > { %v1543_v37 = vmax.f32 %v1541_v35, 0.0  ;;  %v1540_v43 = vsub.f32 %v1536_v36, %v1538_v22 }
 0x944   : > { %v1547_v38 = vadd.f32 1e-05, %v1543_v37  ;;  %v1542_v45 = vmax.f32 %v1540_v43, 0.0 }
 0x946   : > { %2807 = vrsqrt.f32 %v1547_v38  ;;  %v1546_v47 = vadd.f32 1e-05, %v1542_v45 }
 0x948   : > { %2809 = vrsqrt.f32 %v1546_v47 }
 0x953   : > { %v2808_v49 = vpop.eup %2807 }
 0x954   : > { %v1551_v54 = vmul.f32 %v2808_v49, %v1545_v42 }
 0x955   : > { %v2810_v55 = vpop.eup %2809 }
 0x956   : > { %v1563_v56 = vmul.f32 %v1560_v48, %v1551_v54  ;;  %v1550_v57 = vmul.f32 %v2810_v55, %v1544_v50 }
 0x958   : > { %v1562_v59 = vmul.f32 %v1555_v0, %v1550_v57  ;;  %v1575_v1 = vadd.f32 %v1572_v58, %v1563_v56 }
 0x95a   : > { %v1577_v63 = vmin.f32 %v1575_v1, 20.0  ;;  %v1574_v2 = vadd.f32 %v1567_v61, %v1562_v59 }
 0x95c   : > { %v1580_v3 = vmul.f32 1.442695, %v1577_v63  ;;  %v1576_v6 = vmin.f32 %v1574_v2, 20.0 }
 0x95e   : > { %2811 = vpow2.f32 %v1580_v3  ;;  %v1578_v7 = vmul.f32 1.442695, %v1576_v6 }
 0x960   : > { %2813 = vpow2.f32 %v1578_v7 }
 0x96b   : > { %v2812_v9 = vpop.eup %2811 }
 0x96c   : > { %v1583_v10 = vadd.f32 2.0, %v2812_v9 }
 0x96d   : > { %v2814_v13 = vpop.eup %2813 }
 0x96e   : > { %v1585_v14 = vmul.f32 %v2812_v9, %v1583_v10  ;;  %v1582_v23 = vadd.f32 2.0, %v2814_v13 }
 0x970   : > { %v1587_v24 = vadd.f32 2.0, %v1585_v14  ;;  %v1584_v26 = vmul.f32 %v2814_v13, %v1582_v23 }
 0x972   : > { %2815 = vrcp.f32 %v1587_v24  ;;  %v1586_v27 = vadd.f32 2.0, %v1584_v26 }
 0x974   : > { %2817 = vrcp.f32 %v1586_v27 }
 0x97f   : > { %v2816_v28 = vpop.eup %2815 }
 0x980   : > { %v1591_v29 = vmul.f32 %v2816_v28, %v1585_v14 }
 0x981   : > { %v2818_v30 = vpop.eup %2817 }
 0x982   : > { %v1593_v31 = vmul.f32 %v1591_v29, %v1575_v1  ;;  %v1589_v32 = vmul.f32 %v2818_v30, %v1584_v26 }
 0x984   : > { %1622 = vrot.lane.b32.xlu1 %v1593_v31, %s2839_s15  ;;  %v1592_v33 = vmul.f32 %v1589_v32, %v1574_v2 }
 0x986   : > { %1620 = vrot.lane.b32.xlu0 %v1592_v33, %s2839_s15 }
 0x988   : > { %1614 = vrot.lane.b32.xlu1 %v1593_v31, %s2840_s16 }
 0x98a   : > { %1612 = vrot.lane.b32.xlu0 %v1592_v33, %s2840_s16 }
 0x98c   : > { %1606 = vrot.lane.b32.xlu1 %v1593_v31, %s2841_s19 }
 0x98e   : > { %1604 = vrot.lane.b32.xlu0 %v1592_v33, %s2841_s19 }
 0x990   : > { %1598 = vrot.lane.b32.xlu1 %v1593_v31, %s2843_s22 }
 0x992   : > { %1596 = vrot.lane.b32.xlu0 %v1592_v33, %s2843_s22 }
 0x994   : > { %1640 = vperm.xlu1 %2782, %v2235_v40  }
 0x996   : > { %1645 = vperm.xlu0 %2781, %v2236_v39  }
 0x998   : > { %1926 = vperm.xlu1 %2782, %v2238_v41  }
 0x99a   : > { %1921 = vperm.xlu0 %2781, %v2237_v44  }
 0x99c   : > { %1938 = vperm.xlu1 %2782, %v2240_v4  }
 0x99e   : > { %1933 = vperm.xlu0 %2781, %v2239_v5  }
 0x9f6   : > { %v1623_v8 = vpop.permute.xlu1 %1622 }
 0x9f7   : > { %2675 = vmatprep.subr.msk.mxu0 %vm410_vm1, %v1623_v8 }
 0x9f8   : > { %2676 = vmatpush3.msk.msra.mxu0 %vm410_vm1, %v1623_v8  ;;  %v1621_v11 = vpop.permute.xlu0 %1620 }
 0x9f9   : > { %2677 = vmatprep.subr.msk.mxu0 %vm410_vm1, %v1621_v11 }
 0x9fa   : > { %v1615_v12 = vpop.permute.xlu1 %1614  ;;  %2678 = vmatpush3.msk.msra.mxu0 %vm410_vm1, %v1621_v11 }
 0x9fb   : > { %2679 = vmatprep.subr.msk.mxu0 %vm399_vm2, %v1615_v12 }
 0x9fc   : > { %2680 = vmatpush3.msk.msra.mxu0 %vm399_vm2, %v1615_v12  ;;  %v1613_v15 = vpop.permute.xlu0 %1612 }
 0x9fd   : > { %2681 = vmatprep.subr.msk.mxu0 %vm399_vm2, %v1613_v15 }
 0x9fe   : > { %2682 = vmatpush3.msk.msra.mxu0 %vm399_vm2, %v1613_v15  ;;  %v1607_v16 = vpop.permute.xlu1 %1606 }
 0x9ff   : > { %2683 = vmatprep.subr.mxu0 %v1593_v31 }
 0xa00   : > { %2684 = vmatpush3.msra.mxu0 %v1593_v31  ;;  %v1605_v17 = vpop.permute.xlu0 %1604 }
 0xa01   : > { %2685 = vmatprep.subr.mxu0 %v1592_v33 }
 0xa02   : > { %2686 = vmatpush3.msra.mxu0 %v1592_v33  ;;  %v1599_v18 = vpop.permute.xlu1 %1598 }
 0xa03   : > { %2687 = vmatprep.subr.msk.mxu0 %vm388_vm3, %v1607_v16 }
 0xa04   : > { %2688 = vmatpush3.msk.msra.mxu0 %vm388_vm3, %v1607_v16  ;;  %v1597_v19 = vpop.permute.xlu0 %1596 }
 0xa05   : > { %2689 = vmatprep.subr.msk.mxu0 %vm388_vm3, %v1605_v17 }
 0xa06   : > { %2690 = vmatpush3.msk.msra.mxu0 %vm388_vm3, %v1605_v17 }
 0xa07   : > { %2691 = vmatprep.subr.msk.mxu0 %vm377_vm4, %v1599_v18 }
 0xa08   : > { %2692 = vmatpush3.msk.msra.mxu0 %vm377_vm4, %v1599_v18 }
 0xa09   : > { %2693 = vmatprep.subr.msk.mxu0 %vm377_vm4, %v1597_v19 }
 0xa0a   : > { %2694 = vmatpush3.msk.msra.mxu0 %vm377_vm4, %v1597_v19  ;;  %v1981_v19 = vld [vmem:[%s3584_s5] sm:$0xff] }
 0xa0b   : > { %2696 = vmatmul.mubr.msk.f32.vlgmr.msra.gmra.mxu0 %vm433_vm0, %v2242_v20 }
 0xa0c   : > { %2744 = vmatprep.mubr.msk.f32.mxu0 %vm602_vm5, %v3154_v46 }
 0xa0f   : > { %v1641_v22 = vpop.permute.xlu1 %1640 }
 0xa11   : > { %v1646_v36 = vpop.permute.xlu0 %1645 }
 0xa13   : > { %v1927_v6 = vpop.permute.xlu1 %1926 }
 0xa15   : > { %v1922_v9 = vpop.permute.xlu0 %1921 }
 0xa17   : > { %v1939_v26 = vpop.permute.xlu1 %1938 }
 0xa19   : > { %v1934_v29 = vpop.permute.xlu0 %1933 }
 0xacb   : > { %v2697_v21 = vpop.f32.mrf.mxu0 }
 0xacc   : > { %v1726_v43 = vadd.f32 %v2697_v21, %v1646_v36  ;;  %v1987_v36 = vld [vmem:[%s3585_s6 + $0x10] sm:$0xff] }
 0xacd   : > { %v1720_v35 = vpop.f32.mrf.mxu0 }
 0xace   : > { %v1721_v37 = vadd.f32 %v1720_v35, %v1641_v22  ;;  %v1730_v45 = vmul.f32 %v1726_v43, %v1726_v43  ;;  %v1985_v35 = vld [vmem:[%s3585_s6] sm:$0xff] }
 0xad0   : > { %2730 = vmatprep.mubr.f32.mxu1 %v1721_v37  ;;  %v1729_v38 = vmul.f32 %v1721_v37, %v1721_v37 }
 0xad1   : > { %2731 = vmatmul.mubr.f32.vlgmr.msra.gmra.mxu1 %v1726_v43 }
 0xad2   : > { %2733 = vmatprep.mubr.f32.mxu1 %v1729_v38 }
 0xad5   : > { %2734 = vmatmul.mubr.f32.gmra.mxu1 %v1730_v45 }
 0xb91   : > { %v2732_v47 = vpop.f32.mrf.mxu1 }
 0xb93   : > { %v1797_v48 = vpop.f32.mrf.mxu1 }
 0xb95   : > { %v2735_v42 = vpop.f32.mrf.mxu1 }
 0xb96   : > { %2736 = vmatprep.subr.mxu0 %v2735_v42 }
 0xb97   : > { %v1807_v49 = vpop.f32.mrf.mxu1  ;;  %2737 = vmatpush3.msra.mxu0 %v2735_v42  ;;  %v1984_v42 = vld [vmem:[%s3584_s5 + $0x18] sm:$0xff] }
 0xb98   : > { %2738 = vmatprep.subr.mxu0 %v1807_v49 }
 0xb99   : > { %2739 = vmatpush3.msra.mxu0 %v1807_v49 }
 0xb9a   : > { %2740 = vmatprep.subr.mxu0 %v2732_v47 }
 0xb9b   : > { %2741 = vmatpush3.msra.mxu0 %v2732_v47  ;;  %v1982_v47 = vld [vmem:[%s3584_s5 + $0x8] sm:$0xff] }
 0xb9c   : > { %2742 = vmatprep.subr.mxu0 %v1797_v48 }
 0xb9d   : > { %2743 = vmatpush3.msra.mxu0 %v1797_v48  ;;  %v1983_v48 = vld [vmem:[%s3584_s5 + $0x10] sm:$0xff] }
 0xb9e   : > { %2745 = vmatmul.mubr.msk.f32.vlgmr.msra.gmra.mxu0 %vm602_vm5, %v3161_v51 }
 0xb9f   : > { %2747 = vmatprep.mubr.msk.f32.mxu0 %vm602_vm5, %v3166_v52 }
 0xba2   : > { %2748 = vmatmul.mubr.msk.f32.gmra.mxu0 %vm602_vm5, %v3175_v53 }
 0xba3   : > { %2762 = vmatprep.mubr.msk.f32.mxu0 %vm2009_vm7, %v1981_v19 }
 0xc5e   : > { %v2746_v46 = vpop.f32.mrf.mxu0 }
 0xc5f   : > { %v1902_v0 = vmul.f32 0.03125, %v2746_v46 }
 0xc60   : > { %v1882_v50 = vpop.f32.mrf.mxu0 }
 0xc61   : > { %v1901_v54 = vmul.f32 0.03125, %v1882_v50  ;;  %v1906_v56 = vmul.f32 %v1902_v0, %v1902_v0  ;;  %v1912_v53 = vsub.f32 %v1726_v43, %v1902_v0 }
 0xc62   : > { %v2749_v55 = vpop.f32.mrf.mxu0 }
 0xc63   : > { %v1904_v57 = vmul.f32 0.03125, %v2749_v55  ;;  %v1905_v59 = vmul.f32 %v1901_v54, %v1901_v54  ;;  %v1911_v10 = vsub.f32 %v1721_v37, %v1901_v54 }
 0xc64   : > { %v1892_v58 = vpop.f32.mrf.mxu0 }
 0xc65   : > { %v1908_v1 = vsub.f32 %v1904_v57, %v1906_v56  ;;  %v1903_v61 = vmul.f32 0.03125, %v1892_v58 }
 0xc67   : > { %v1910_v63 = vmax.f32 %v1908_v1, 0.0  ;;  %v1907_v2 = vsub.f32 %v1903_v61, %v1905_v59 }
 0xc69   : > { %v1914_v51 = vadd.f32 1e-05, %v1910_v63  ;;  %v1909_v3 = vmax.f32 %v1907_v2, 0.0 }
 0xc6b   : > { %2819 = vrsqrt.f32 %v1914_v51  ;;  %v1913_v52 = vadd.f32 1e-05, %v1909_v3 }
 0xc6d   : > { %2821 = vrsqrt.f32 %v1913_v52 }
 0xc78   : > { %v2820_v7 = vpop.eup %2819 }
 0xc79   : > { %v1918_v13 = vmul.f32 %v2820_v7, %v1912_v53 }
 0xc7a   : > { %v2822_v14 = vpop.eup %2821 }
 0xc7b   : > { %v1930_v23 = vmul.f32 %v1927_v6, %v1918_v13  ;;  %v1917_v24 = vmul.f32 %v2822_v14, %v1911_v10 }
 0xc7d   : > { %v1942_v27 = vadd.f32 %v1939_v26, %v1930_v23  ;;  %v1929_v28 = vmul.f32 %v1922_v9, %v1917_v24 }
 0xc7f   : > { %v1944_v30 = vmin.f32 %v1942_v27, 20.0  ;;  %v1941_v31 = vadd.f32 %v1934_v29, %v1929_v28 }
 0xc81   : > { %v1947_v32 = vmul.f32 1.442695, %v1944_v30  ;;  %v1943_v33 = vmin.f32 %v1941_v31, 20.0 }
 0xc83   : > { %2823 = vpow2.f32 %v1947_v32  ;;  %v1945_v34 = vmul.f32 1.442695, %v1943_v33 }
 0xc85   : > { %2825 = vpow2.f32 %v1945_v34 }
 0xc90   : > { %v2824_v40 = vpop.eup %2823 }
 0xc91   : > { %v1950_v39 = vadd.f32 2.0, %v2824_v40 }
 0xc92   : > { %v2826_v41 = vpop.eup %2825 }
 0xc93   : > { %v1952_v44 = vmul.f32 %v2824_v40, %v1950_v39  ;;  %v1949_v4 = vadd.f32 2.0, %v2826_v41 }
 0xc95   : > { %v1954_v5 = vadd.f32 2.0, %v1952_v44  ;;  %v1951_v8 = vmul.f32 %v2826_v41, %v1949_v4 }
 0xc97   : > { %2827 = vrcp.f32 %v1954_v5  ;;  %v1953_v11 = vadd.f32 2.0, %v1951_v8 }
 0xc99   : > { %2829 = vrcp.f32 %v1953_v11 }
 0xca4   : > { %v2828_v12 = vpop.eup %2827 }
 0xca5   : > { %v1958_v15 = vmul.f32 %v2828_v12, %v1952_v44 }
 0xca6   : > { %v2830_v16 = vpop.eup %2829 }
 0xca7   : > { %v1960_v17 = vmul.f32 %v1958_v15, %v1942_v27  ;;  %v1956_v18 = vmul.f32 %v2830_v16, %v1951_v8 }
 0xca9   : > { %v1962_v20 = vadd.f32 %v1960_v17, %v3315_v60  ;;  %v1959_v21 = vmul.f32 %v1956_v18, %v1941_v31  ;;  %v1986_v60 = vld [vmem:[%s3585_s6 + $0x8] sm:$0xff] }
 0xcab   : > { %1975 = vrot.lane.b32.xlu1 %v1962_v20, %s2840_s16  ;;  %v1961_v22 = vadd.f32 %v1959_v21, %v3317_v62  ;;  %v1988_v62 = vld [vmem:[%s3585_s6 + $0x18] sm:$0xff] }
 0xcad   : > { %1973 = vrot.lane.b32.xlu0 %v1961_v22, %s2840_s16 }
 0xcaf   : > { %1967 = vrot.lane.b32.xlu1 %v1962_v20, %s2841_s19 }
 0xcb1   : > { %1965 = vrot.lane.b32.xlu0 %v1961_v22, %s2841_s19 }
 0xcb3   : > { %1991 = vperm.xlu1 %2782, %v1985_v35  }
 0xcb5   : > { %1996 = vperm.xlu0 %2781, %v1986_v60  }
 0xcb7   : > { %2001 = vperm.xlu1 %2782, %v1987_v36  }
 0xcb9   : > { %2006 = vperm.xlu0 %2781, %v1988_v62  }
 0xd1d   : > { %v1976_v37 = vpop.permute.xlu1 %1975 }
 0xd1e   : > { %2750 = vmatprep.subr.msk.mxu0 %vm399_vm2, %v1976_v37 }
 0xd1f   : > { %2751 = vmatpush3.msk.msra.mxu0 %vm399_vm2, %v1976_v37  ;;  %v1974_v43 = vpop.permute.xlu0 %1973 }
 0xd20   : > { %2752 = vmatprep.subr.msk.mxu0 %vm399_vm2, %v1974_v43 }
 0xd21   : > { %2753 = vmatpush3.msk.msra.mxu0 %vm399_vm2, %v1974_v43  ;;  %v1968_v38 = vpop.permute.xlu1 %1967 }
 0xd22   : > { %2754 = vmatprep.subr.mxu0 %v1962_v20 }
 0xd23   : > { %2755 = vmatpush3.msra.mxu0 %v1962_v20  ;;  %v1966_v45 = vpop.permute.xlu0 %1965 }
 0xd24   : > { %2756 = vmatprep.subr.mxu0 %v1961_v22 }
 0xd25   : > { %2757 = vmatpush3.msra.mxu0 %v1961_v22 }
 0xd26   : > { %2758 = vmatprep.subr.msk.mxu0 %vm388_vm3, %v1968_v38 }
 0xd27   : > { %2759 = vmatpush3.msk.msra.mxu0 %vm388_vm3, %v1968_v38 }
 0xd28   : > { %2760 = vmatprep.subr.msk.mxu0 %vm388_vm3, %v1966_v45 }
 0xd29   : > { %2761 = vmatpush3.msk.msra.mxu0 %vm388_vm3, %v1966_v45 }
 0xd2a   : > { %2763 = vmatmul.mubr.msk.f32.vlgmr.msra.gmra.mxu0 %vm2009_vm7, %v1982_v47 }
 0xd2b   : > { %2765 = vmatprep.mubr.msk.f32.mxu0 %vm2009_vm7, %v1983_v48 }
 0xd2e   : > { %2766 = vmatmul.mubr.msk.f32.gmra.mxu0 %vm2009_vm7, %v1984_v42  ;;  %v1992_v46 = vpop.permute.xlu1 %1991 }
 0xd30   : > { %v1997_v49 = vpop.permute.xlu0 %1996 }
 0xd32   : > { %v2002_v58 = vpop.permute.xlu1 %2001 }
 0xd34   : > { %v2007_v55 = vpop.permute.xlu0 %2006 }
 0xdea   : > { %v2764_v0 = vpop.f32.mrf.mxu0 }
 0xdeb   : > { %v2094_v25 = vadd.f32 %v2764_v0, %v1997_v49 }
 0xdec   : > { %v2088_v50 = vpop.f32.mrf.mxu0 }
 0xded   : > { %2108 = vst [vmem:[%s332_s24 + $0x8] sm:$0xff] %v2094_v25  ;;  %v2089_v54 = vadd.f32 %v2088_v50, %v1992_v46 }
 0xdee   : > { %v2767_v56 = vpop.f32.mrf.mxu0 }
 0xdef   : > { %2107 = vst [vmem:[%s332_s24] sm:$0xff] %v2089_v54  ;;  %v2104_v57 = vadd.f32 %v2767_v56, %v2007_v55 }
 0xdf0   : > { %v2098_v59 = vpop.f32.mrf.mxu0 }
 0xdf1   : > { %2110 = vst [vmem:[%s332_s24 + $0x18] sm:$0xff] %v2104_v57  ;;  %v2099_v1 = vadd.f32 %v2098_v59, %v2002_v58 }
 0xdf3   : > { %2109 = vst [vmem:[%s332_s24 + $0x10] sm:$0xff] %v2099_v1 }
 0xdf4 PF: > { %s19_s30 = sadd.s32 1, %s2837_s30  }
 0xdf5   : > { %p16_p4 = scmp.ge.s32.totalorder %s19_s30, 4  }
 0xdf7   :  { %18 = sbr.rel (!%p16_p4) target bundleno = 1 (0x1), region = 92 }

</bundles_post_ra>
